<compile_context>
chip_gen: v5e
topology: v5e:2x2
jax: 0.10.0
libtpu: 0.0.40
codegen_flags: <defaults>
</compile_context>

<pallas_src>
import jax
import jax.numpy as jnp
import numpy as np
from jax.experimental import pallas as pl
from jax.experimental.pallas import tpu as pltpu

# ----------------------------- small config ---------------------------------
B = 1                # batch (module broadcasting requires 1)
T = 8                # question sequence length
E = 32               # embedding_size
U = 16               # LSTM_units
L = 1                # LSTM_layers
C_IMG = 8            # post-backbone feature channels (stand-in for ResNet's 2048)
H = W = 4            # post-backbone spatial dims
N = H * W            # spatial positions = feat_size * num_img_glimpse
NUM_Q_GLIMPSE = 2
MCB_OUT = 128        # stand-in for 1000
MCB_FACTOR = 5
MCB_OUTPUT_DIM = MCB_OUT * MCB_FACTOR     # stand-in for 5000
QATT_HIDDEN = 64     # stand-in for 512
ANS_VOCAB = 32
PRED_PAD = 128       # lane-dense padded width of the classifier output


# ----------------------------- fused kernel ----------------------------------
def fused_mcb_kernel(x_ref, wih_ref, whh_ref, blstm_ref,
                     wq1_ref, bq1_ref, wq2_ref, bq2_ref,
                     ifeat_ref, wimg_ref, bimg_ref, wqproj_ref, bqproj_ref,
                     wpred_ref, bpred_ref,
                     pred_ref, lstm_buf):
    # ---- LSTM (batch=1, single layer, statically unrolled over T) -------------
    # Hoisted input projection: one (T,E)@(E,4U) matmul instead of T degenerate
    # M=1 matmuls on the serial critical path.  (f32 throughout: v5e-safe.)
    gx = (jnp.dot(x_ref[...], wih_ref[...], preferred_element_type=jnp.float32)
          + blstm_ref[...])                                             # (T, 4U)
    whh = whh_ref[...]
    U_ = whh.shape[0]
    h = jnp.zeros((1, U_), jnp.float32)
    c = jnp.zeros((1, U_), jnp.float32)
    for t in range(gx.shape[0]):                      # inherently serial recurrence
        gates = gx[t:t + 1, :] + jnp.dot(h, whh, preferred_element_type=jnp.float32)
        i = jax.nn.sigmoid(gates[:, 0 * U_:1 * U_])
        f = jax.nn.sigmoid(gates[:, 1 * U_:2 * U_])
        g = jnp.tanh(gates[:, 2 * U_:3 * U_])
        o = jax.nn.sigmoid(gates[:, 3 * U_:4 * U_])
        c = f * c + i * g
        h = o * jnp.tanh(c)
        lstm_buf[pl.ds(t, 1), :] = h                  # VMEM scratch; never leaves chip
    lstm_out = lstm_buf[...]                          # (T, U), single full read

    # ---- Question attention (1x1 convs as matmuls) ----------------------------
    hidden = jnp.maximum(
        jnp.dot(lstm_out, wq1_ref[...], preferred_element_type=jnp.float32)
        + bq1_ref[...], 0.0)                                            # (T, 512')
    logits_q = (jnp.dot(hidden, wq2_ref[...], preferred_element_type=jnp.float32)
                + bq2_ref[...])                                         # (T, G)
    m_q = jnp.max(logits_q, axis=0, keepdims=True)
    e_q = jnp.exp(logits_q - m_q)
    att = e_q * pl.reciprocal(jnp.sum(e_q, axis=0, keepdims=True), approx=True)
    # glimpse g: sum_t att[t,g] * lstm[t,:]  -> (G, U)
    qfeat = jax.lax.dot_general(att, lstm_out, (((0,), (0,)), ((), ())),
                                preferred_element_type=jnp.float32)     # (G, U)

    # ---- MCB fusion: project, multiply, factor sum-pool, signed sqrt, L2 norm --
    img_proj = (jnp.dot(ifeat_ref[...], wimg_ref[...],
                        preferred_element_type=jnp.float32)
                + bimg_ref[...])                                        # (C, P) perm cols
    # q_feat flattened as [g0 units, g1 units] without an in-kernel reshape:
    # contract each glimpse row against the matching row-block of Linear1_q_proj.
    ques_proj = (jnp.dot(qfeat[0:1, :], wqproj_ref[0:U, :],
                         preferred_element_type=jnp.float32)
                 + jnp.dot(qfeat[1:2, :], wqproj_ref[U:2 * U, :],
                           preferred_element_type=jnp.float32)
                 + bqproj_ref[...])                                     # (1, P) perm cols
    iq = img_proj * ques_proj                                           # (C, P)
    # Columns were permuted host-side into (factor, group) order, so the MCB
    # sum-pool over factor groups is a sum of MCB_FACTOR lane-aligned 128-wide
    # slices: no pool-matrix matmul, no pool-matrix DMA.
    pooled = iq[:, 0:MCB_OUT]
    for fct in range(1, MCB_FACTOR):
        pooled = pooled + iq[:, fct * MCB_OUT:(fct + 1) * MCB_OUT]      # (C, MCB_OUT)
    # signed square root
    sqrt_ = jnp.sqrt(jnp.maximum(pooled, 0.0)) - jnp.sqrt(jnp.maximum(-pooled, 0.0))
    # row-wise L2 normalize (F.normalize default: dim=1, eps=1e-12) via rsqrt
    ss = jnp.sum(sqrt_ * sqrt_, axis=1, keepdims=True)
    iq_norm = sqrt_ * jax.lax.rsqrt(jnp.maximum(ss, 1e-24))

    # ---- Classifier + softmax (lane-padded to 128 output columns) -------------
    logits_p = (jnp.dot(iq_norm, wpred_ref[...], preferred_element_type=jnp.float32)
                + bpred_ref[...])                                       # (C, 128)
    m_p = jnp.max(logits_p, axis=1, keepdims=True)
    e_p = jnp.exp(logits_p - m_p)                     # padded cols: exp(-1e30) == 0
    pred_ref[...] = e_p * pl.reciprocal(jnp.sum(e_p, axis=1, keepdims=True),
                                        approx=True)


# ----------------------------- wrapper ----------------------------------------
def _vmem():
    return pl.BlockSpec(memory_space=pltpu.MemorySpace.VMEM)


def prepare_kernel_params(params):
    """One-time host-side repack of module parameters into the kernel layout:
    MCB projection columns permuted to (factor, group) order, classifier padded
    to 128 lane-dense output columns (pad bias -1e30 -> exactly 0 probability)."""
    p_new = jnp.arange(MCB_OUTPUT_DIM)
    # new column f*MCB_OUT + m  <-  old column m*MCB_FACTOR + f
    perm = (p_new % MCB_OUT) * MCB_FACTOR + (p_new // MCB_OUT)
    kp = {k: v for k, v in params.items()}
    kp["wimg_p"] = params["wimg"][:, perm]
    kp["bimg_p"] = params["bimg"][:, perm]
    kp["wqproj_p"] = params["wqproj"][:, perm]
    kp["bqproj_p"] = params["bqproj"][:, perm]
    pad = PRED_PAD - ANS_VOCAB
    kp["wpred_pad"] = jnp.pad(params["wpred"], ((0, 0), (0, pad)))
    kp["bpred_pad"] = jnp.pad(params["bpred"], ((0, 0), (0, pad)),
                              constant_values=-1e30)
    return kp


def mcb_coatt_forward(kparams, ques_embed, img_feat):
    """ques_embed: (1, T, E) batch-first; img_feat: (1, C_IMG, H, W) NCHW feature map."""
    assert ques_embed.shape[0] == 1 and img_feat.shape[0] == 1

    # ques_embed.permute(1,0,2) -> (T, B, E); batch==1 -> (T, E)
    x = ques_embed[0].astype(jnp.float32)
    # image features: NCHW -> (C, H*W) == i_feat_resh for batch 1
    i_feat = img_feat[0].reshape(C_IMG, N).astype(jnp.float32)

    pred_pad = pl.pallas_call(
        fused_mcb_kernel,
        out_shape=jax.ShapeDtypeStruct((C_IMG, PRED_PAD), jnp.float32),
        in_specs=[_vmem() for _ in range(15)],
        out_specs=_vmem(),
        scratch_shapes=[pltpu.VMEM((T, U), jnp.float32)],
    )(x, kparams["w_ih_0"], kparams["w_hh_0"], kparams["b_0"],
      kparams["wq1"], kparams["bq1"], kparams["wq2"], kparams["bq2"],
      i_feat, kparams["wimg_p"], kparams["bimg_p"],
      kparams["wqproj_p"], kparams["bqproj_p"],
      kparams["wpred_pad"], kparams["bpred_pad"])

    return pred_pad[:, :ANS_VOCAB]   # (C_IMG, ANS_VOCAB) — matches torch output shape


# ----------------------------- plain-JAX reference ----------------------------
def reference_forward(params, ques_embed, img_feat):
    x = ques_embed[0].astype(jnp.float32)
    inp = x
    for l in range(L):
        wih, whh, b = params[f"w_ih_{l}"], params[f"w_hh_{l}"], params[f"b_{l}"]
        h = jnp.zeros((1, U), jnp.float32)
        c = jnp.zeros((1, U), jnp.float32)
        rows = []
        for t in range(T):
            gates = inp[t:t + 1] @ wih + h @ whh + b
            i = jax.nn.sigmoid(gates[:, :U])
            f = jax.nn.sigmoid(gates[:, U:2 * U])
            g = jnp.tanh(gates[:, 2 * U:3 * U])
            o = jax.nn.sigmoid(gates[:, 3 * U:])
            c = f * c + i * g
            h = o * jnp.tanh(c)
            rows.append(h)
        inp = jnp.concatenate(rows, axis=0)
    lstm_out = inp
    hidden = jax.nn.relu(lstm_out @ params["wq1"] + params["bq1"])
    logits = hidden @ params["wq2"] + params["bq2"]
    att = jax.nn.softmax(logits, axis=0)
    qfeat = att.T @ lstm_out
    q_feat = qfeat.reshape(1, NUM_Q_GLIMPSE * U)
    i_feat = img_feat[0].reshape(C_IMG, N).astype(jnp.float32)
    img_proj = i_feat @ params["wimg"] + params["bimg"]
    ques_proj = q_feat @ params["wqproj"] + params["bqproj"]
    iq = img_proj * ques_proj
    pooled = iq.reshape(C_IMG, MCB_OUT, MCB_FACTOR).sum(axis=2)
    sqrt_ = jnp.sqrt(jax.nn.relu(pooled)) - jnp.sqrt(jax.nn.relu(-pooled))
    nrm = jnp.maximum(jnp.linalg.norm(sqrt_, axis=1, keepdims=True), 1e-12)
    iq_norm = sqrt_ / nrm
    logits_p = iq_norm @ params["wpred"] + params["bpred"]
    return jax.nn.softmax(logits_p, axis=1)


# ----------------------------- parameter init ---------------------------------
def build_params(key):
    ks = jax.random.split(key, 16)
    nrm = lambda k, s, sc=0.1: jax.random.normal(k, s, jnp.float32) * sc
    p = {}
    # nn.LSTM: weight_ih_l0 (4U, E), weight_hh_l0 (4U, U), bias_ih+bias_hh (4U,)
    # stored transposed for (rows, C_in) @ (C_in, C_out) matmuls.
    p["w_ih_0"] = nrm(ks[0], (4 * U, E)).T
    p["w_hh_0"] = nrm(ks[1], (4 * U, U)).T
    p["b_0"] = (nrm(ks[2], (4 * U,), 0.05) + nrm(ks[3], (4 * U,), 0.05))[None, :]
    # Conv1_Qatt (512, U, 1, 1), Conv2_Qatt (2, 512, 1, 1) — as (C_in, C_out) matmuls
    p["wq1"] = nrm(ks[4], (QATT_HIDDEN, U)).T
    p["bq1"] = nrm(ks[5], (QATT_HIDDEN,), 0.05)[None, :]
    p["wq2"] = nrm(ks[6], (NUM_Q_GLIMPSE, QATT_HIDDEN)).T
    p["bq2"] = nrm(ks[7], (NUM_Q_GLIMPSE,), 0.05)[None, :]
    # Linear_img_proj (P, feat_size*2 = N), Linear1_q_proj (P, 2U)
    p["wimg"] = nrm(ks[8], (MCB_OUTPUT_DIM, N)).T
    p["bimg"] = nrm(ks[9], (MCB_OUTPUT_DIM,), 0.05)[None, :]
    p["wqproj"] = nrm(ks[10], (MCB_OUTPUT_DIM, NUM_Q_GLIMPSE * U)).T
    p["bqproj"] = nrm(ks[11], (MCB_OUTPUT_DIM,), 0.05)[None, :]
    # Linear_predict (V, MCB_out)
    p["wpred"] = nrm(ks[12], (ANS_VOCAB, MCB_OUT)).T
    p["bpred"] = nrm(ks[13], (ANS_VOCAB,), 0.05)[None, :]
    # NOTE: Conv1_Iatt/Conv2_Iatt params are omitted — that branch only sets
    # self.iatt_maps and never feeds the returned prediction.
    return p


# ----------------------------- main --------------------------------------------
if __name__ == "__main__":
    root = jax.random.PRNGKey(0)
    k_param, k_q, k_i = jax.random.split(root, 3)
    params = build_params(k_param)
    kparams = prepare_kernel_params(params)      # one-time host-side repack

    ques_embed = jax.random.normal(k_q, (B, T, E), jnp.float32)          # (1, 8, 32)
    img_feat = jax.random.normal(k_i, (B, C_IMG, H, W), jnp.float32)     # (1, 8, 4, 4)

    fwd = jax.jit(lambda q, im: mcb_coatt_forward(kparams, q, im))
    pred = fwd(ques_embed, img_feat)
    jax.block_until_ready(pred)

    ref = jax.jit(lambda q, im: reference_forward(params, q, im))(ques_embed, img_feat)
    jax.block_until_ready(ref)

    assert pred.shape == (C_IMG, ANS_VOCAB)
    np.testing.assert_allclose(np.asarray(pred), np.asarray(ref), rtol=2e-2, atol=2e-3)
    print("KERNEL_OK")
</pallas_src>

<mosaic_0001>
module attributes {stable_mosaic.version = 11 : i64} {
  func.func @fused_mcb_kernel(%arg0: memref<8x32xf32, #tpu.memory_space<vmem>>, %arg1: memref<32x64xf32, #tpu.memory_space<vmem>>, %arg2: memref<16x64xf32, #tpu.memory_space<vmem>>, %arg3: memref<1x64xf32, #tpu.memory_space<vmem>>, %arg4: memref<16x64xf32, #tpu.memory_space<vmem>>, %arg5: memref<1x64xf32, #tpu.memory_space<vmem>>, %arg6: memref<64x2xf32, #tpu.memory_space<vmem>>, %arg7: memref<1x2xf32, #tpu.memory_space<vmem>>, %arg8: memref<8x16xf32, #tpu.memory_space<vmem>>, %arg9: memref<16x640xf32, #tpu.memory_space<vmem>>, %arg10: memref<1x640xf32, #tpu.memory_space<vmem>>, %arg11: memref<32x640xf32, #tpu.memory_space<vmem>>, %arg12: memref<1x640xf32, #tpu.memory_space<vmem>>, %arg13: memref<128x128xf32, #tpu.memory_space<vmem>>, %arg14: memref<1x128xf32, #tpu.memory_space<vmem>>, %arg15: memref<8x128xf32, #tpu.memory_space<vmem>>, %arg16: memref<8x16xf32, #tpu.memory_space<vmem>>) attributes {dimension_semantics = [], scalar_prefetch = 0 : i64, scratch_operands = 1 : i64, tpu.core_type = #tpu.core_type<tc>} {
    %c0 = arith.constant 0 : index
    %c0_0 = arith.constant 0 : index
    %0 = vector.load %arg0[%c0, %c0_0] : memref<8x32xf32, #tpu.memory_space<vmem>>, vector<8x32xf32>
    %c0_1 = arith.constant 0 : index
    %c0_2 = arith.constant 0 : index
    %1 = vector.load %arg1[%c0_1, %c0_2] : memref<32x64xf32, #tpu.memory_space<vmem>>, vector<32x64xf32>
    %cst = arith.constant dense<0.000000e+00> : vector<8x64xf32>
    %2 = tpu.matmul %0, %1, %cst {dimension_numbers = #tpu.dot_dimension_numbers<[1], [0], [0], [1], [0, 0, 1, 1], [], []>} : vector<8x32xf32>, vector<32x64xf32>, vector<8x64xf32> -> vector<8x64xf32>
    %c0_3 = arith.constant 0 : index
    %c0_4 = arith.constant 0 : index
    %3 = vector.load %arg3[%c0_3, %c0_4] : memref<1x64xf32, #tpu.memory_space<vmem>>, vector<1x64xf32>
    %4 = vector.broadcast %3 : vector<1x64xf32> to vector<8x64xf32>
    %5 = arith.addf %2, %4 : vector<8x64xf32>
    %c0_5 = arith.constant 0 : index
    %c0_6 = arith.constant 0 : index
    %6 = vector.load %arg2[%c0_5, %c0_6] : memref<16x64xf32, #tpu.memory_space<vmem>>, vector<16x64xf32>
    %cst_7 = arith.constant 0.000000e+00 : f32
    %7 = vector.broadcast %cst_7 : f32 to vector<1x16xf32>
    %cst_8 = arith.constant 0.000000e+00 : f32
    %8 = vector.broadcast %cst_8 : f32 to vector<1x16xf32>
    %9 = vector.extract_strided_slice %5 {offsets = [0, 0], sizes = [1, 64], strides = [1, 1]} : vector<8x64xf32> to vector<1x64xf32>
    %cst_9 = arith.constant dense<0.000000e+00> : vector<1x64xf32>
    %10 = tpu.matmul %7, %6, %cst_9 {dimension_numbers = #tpu.dot_dimension_numbers<[1], [0], [0], [1], [0, 0, 1, 1], [], []>} : vector<1x16xf32>, vector<16x64xf32>, vector<1x64xf32> -> vector<1x64xf32>
    %11 = arith.addf %9, %10 : vector<1x64xf32>
    %12 = vector.extract_strided_slice %11 {offsets = [0, 0], sizes = [1, 16], strides = [1, 1]} : vector<1x64xf32> to vector<1x16xf32>
    %13 = arith.negf %12 : vector<1x16xf32>
    %14 = math.exp %13 : vector<1x16xf32>
    %cst_10 = arith.constant 1.000000e+00 : f32
    %15 = vector.broadcast %cst_10 : f32 to vector<1x16xf32>
    %16 = arith.addf %15, %14 : vector<1x16xf32>
    %17 = arith.divf %15, %16 : vector<1x16xf32>
    %18 = vector.extract_strided_slice %11 {offsets = [0, 16], sizes = [1, 16], strides = [1, 1]} : vector<1x64xf32> to vector<1x16xf32>
    %19 = arith.negf %18 : vector<1x16xf32>
    %20 = math.exp %19 : vector<1x16xf32>
    %cst_11 = arith.constant 1.000000e+00 : f32
    %21 = vector.broadcast %cst_11 : f32 to vector<1x16xf32>
    %22 = arith.addf %21, %20 : vector<1x16xf32>
    %23 = arith.divf %21, %22 : vector<1x16xf32>
    %24 = vector.extract_strided_slice %11 {offsets = [0, 32], sizes = [1, 16], strides = [1, 1]} : vector<1x64xf32> to vector<1x16xf32>
    %25 = math.tanh %24 : vector<1x16xf32>
    %26 = vector.extract_strided_slice %11 {offsets = [0, 48], sizes = [1, 16], strides = [1, 1]} : vector<1x64xf32> to vector<1x16xf32>
    %27 = arith.negf %26 : vector<1x16xf32>
    %28 = math.exp %27 : vector<1x16xf32>
    %cst_12 = arith.constant 1.000000e+00 : f32
    %29 = vector.broadcast %cst_12 : f32 to vector<1x16xf32>
    %30 = arith.addf %29, %28 : vector<1x16xf32>
    %31 = arith.divf %29, %30 : vector<1x16xf32>
    %32 = arith.mulf %23, %8 : vector<1x16xf32>
    %33 = arith.mulf %17, %25 : vector<1x16xf32>
    %34 = arith.addf %32, %33 : vector<1x16xf32>
    %35 = math.tanh %34 : vector<1x16xf32>
    %36 = arith.mulf %31, %35 : vector<1x16xf32>
    %c0_13 = arith.constant 0 : index
    %c0_14 = arith.constant 0 : index
    %37 = vector.load %arg16[%c0_13, %c0_14] : memref<8x16xf32, #tpu.memory_space<vmem>>, vector<1x16xf32>
    tpu.vector_store %arg16[%c0_13, %c0_14], %36 {strides = array<i32>} : memref<8x16xf32, #tpu.memory_space<vmem>>, vector<1x16xf32>,
    %38 = vector.extract_strided_slice %5 {offsets = [1, 0], sizes = [1, 64], strides = [1, 1]} : vector<8x64xf32> to vector<1x64xf32>
    %cst_15 = arith.constant dense<0.000000e+00> : vector<1x64xf32>
    %39 = tpu.matmul %36, %6, %cst_15 {dimension_numbers = #tpu.dot_dimension_numbers<[1], [0], [0], [1], [0, 0, 1, 1], [], []>} : vector<1x16xf32>, vector<16x64xf32>, vector<1x64xf32> -> vector<1x64xf32>
    %40 = arith.addf %38, %39 : vector<1x64xf32>
    %41 = vector.extract_strided_slice %40 {offsets = [0, 0], sizes = [1, 16], strides = [1, 1]} : vector<1x64xf32> to vector<1x16xf32>
    %42 = arith.negf %41 : vector<1x16xf32>
    %43 = math.exp %42 : vector<1x16xf32>
    %cst_16 = arith.constant 1.000000e+00 : f32
    %44 = vector.broadcast %cst_16 : f32 to vector<1x16xf32>
    %45 = arith.addf %44, %43 : vector<1x16xf32>
    %46 = arith.divf %44, %45 : vector<1x16xf32>
    %47 = vector.extract_strided_slice %40 {offsets = [0, 16], sizes = [1, 16], strides = [1, 1]} : vector<1x64xf32> to vector<1x16xf32>
    %48 = arith.negf %47 : vector<1x16xf32>
    %49 = math.exp %48 : vector<1x16xf32>
    %cst_17 = arith.constant 1.000000e+00 : f32
    %50 = vector.broadcast %cst_17 : f32 to vector<1x16xf32>
    %51 = arith.addf %50, %49 : vector<1x16xf32>
    %52 = arith.divf %50, %51 : vector<1x16xf32>
    %53 = vector.extract_strided_slice %40 {offsets = [0, 32], sizes = [1, 16], strides = [1, 1]} : vector<1x64xf32> to vector<1x16xf32>
    %54 = math.tanh %53 : vector<1x16xf32>
    %55 = vector.extract_strided_slice %40 {offsets = [0, 48], sizes = [1, 16], strides = [1, 1]} : vector<1x64xf32> to vector<1x16xf32>
    %56 = arith.negf %55 : vector<1x16xf32>
    %57 = math.exp %56 : vector<1x16xf32>
    %cst_18 = arith.constant 1.000000e+00 : f32
    %58 = vector.broadcast %cst_18 : f32 to vector<1x16xf32>
    %59 = arith.addf %58, %57 : vector<1x16xf32>
    %60 = arith.divf %58, %59 : vector<1x16xf32>
    %61 = arith.mulf %52, %34 : vector<1x16xf32>
    %62 = arith.mulf %46, %54 : vector<1x16xf32>
    %63 = arith.addf %61, %62 : vector<1x16xf32>
    %64 = math.tanh %63 : vector<1x16xf32>
    %65 = arith.mulf %60, %64 : vector<1x16xf32>
    %c1 = arith.constant 1 : index
    %c0_19 = arith.constant 0 : index
    %66 = vector.load %arg16[%c1, %c0_19] : memref<8x16xf32, #tpu.memory_space<vmem>>, vector<1x16xf32>
    tpu.vector_store %arg16[%c1, %c0_19], %65 {strides = array<i32>} : memref<8x16xf32, #tpu.memory_space<vmem>>, vector<1x16xf32>,
    %67 = vector.extract_strided_slice %5 {offsets = [2, 0], sizes = [1, 64], strides = [1, 1]} : vector<8x64xf32> to vector<1x64xf32>
    %cst_20 = arith.constant dense<0.000000e+00> : vector<1x64xf32>
    %68 = tpu.matmul %65, %6, %cst_20 {dimension_numbers = #tpu.dot_dimension_numbers<[1], [0], [0], [1], [0, 0, 1, 1], [], []>} : vector<1x16xf32>, vector<16x64xf32>, vector<1x64xf32> -> vector<1x64xf32>
    %69 = arith.addf %67, %68 : vector<1x64xf32>
    %70 = vector.extract_strided_slice %69 {offsets = [0, 0], sizes = [1, 16], strides = [1, 1]} : vector<1x64xf32> to vector<1x16xf32>
    %71 = arith.negf %70 : vector<1x16xf32>
    %72 = math.exp %71 : vector<1x16xf32>
    %cst_21 = arith.constant 1.000000e+00 : f32
    %73 = vector.broadcast %cst_21 : f32 to vector<1x16xf32>
    %74 = arith.addf %73, %72 : vector<1x16xf32>
    %75 = arith.divf %73, %74 : vector<1x16xf32>
    %76 = vector.extract_strided_slice %69 {offsets = [0, 16], sizes = [1, 16], strides = [1, 1]} : vector<1x64xf32> to vector<1x16xf32>
    %77 = arith.negf %76 : vector<1x16xf32>
    %78 = math.exp %77 : vector<1x16xf32>
    %cst_22 = arith.constant 1.000000e+00 : f32
    %79 = vector.broadcast %cst_22 : f32 to vector<1x16xf32>
    %80 = arith.addf %79, %78 : vector<1x16xf32>
    %81 = arith.divf %79, %80 : vector<1x16xf32>
    %82 = vector.extract_strided_slice %69 {offsets = [0, 32], sizes = [1, 16], strides = [1, 1]} : vector<1x64xf32> to vector<1x16xf32>
    %83 = math.tanh %82 : vector<1x16xf32>
    %84 = vector.extract_strided_slice %69 {offsets = [0, 48], sizes = [1, 16], strides = [1, 1]} : vector<1x64xf32> to vector<1x16xf32>
    %85 = arith.negf %84 : vector<1x16xf32>
    %86 = math.exp %85 : vector<1x16xf32>
    %cst_23 = arith.constant 1.000000e+00 : f32
    %87 = vector.broadcast %cst_23 : f32 to vector<1x16xf32>
    %88 = arith.addf %87, %86 : vector<1x16xf32>
    %89 = arith.divf %87, %88 : vector<1x16xf32>
    %90 = arith.mulf %81, %63 : vector<1x16xf32>
    %91 = arith.mulf %75, %83 : vector<1x16xf32>
    %92 = arith.addf %90, %91 : vector<1x16xf32>
    %93 = math.tanh %92 : vector<1x16xf32>
    %94 = arith.mulf %89, %93 : vector<1x16xf32>
    %c2 = arith.constant 2 : index
    %c0_24 = arith.constant 0 : index
    %95 = vector.load %arg16[%c2, %c0_24] : memref<8x16xf32, #tpu.memory_space<vmem>>, vector<1x16xf32>
    tpu.vector_store %arg16[%c2, %c0_24], %94 {strides = array<i32>} : memref<8x16xf32, #tpu.memory_space<vmem>>, vector<1x16xf32>,
    %96 = vector.extract_strided_slice %5 {offsets = [3, 0], sizes = [1, 64], strides = [1, 1]} : vector<8x64xf32> to vector<1x64xf32>
    %cst_25 = arith.constant dense<0.000000e+00> : vector<1x64xf32>
    %97 = tpu.matmul %94, %6, %cst_25 {dimension_numbers = #tpu.dot_dimension_numbers<[1], [0], [0], [1], [0, 0, 1, 1], [], []>} : vector<1x16xf32>, vector<16x64xf32>, vector<1x64xf32> -> vector<1x64xf32>
    %98 = arith.addf %96, %97 : vector<1x64xf32>
    %99 = vector.extract_strided_slice %98 {offsets = [0, 0], sizes = [1, 16], strides = [1, 1]} : vector<1x64xf32> to vector<1x16xf32>
    %100 = arith.negf %99 : vector<1x16xf32>
    %101 = math.exp %100 : vector<1x16xf32>
    %cst_26 = arith.constant 1.000000e+00 : f32
    %102 = vector.broadcast %cst_26 : f32 to vector<1x16xf32>
    %103 = arith.addf %102, %101 : vector<1x16xf32>
    %104 = arith.divf %102, %103 : vector<1x16xf32>
    %105 = vector.extract_strided_slice %98 {offsets = [0, 16], sizes = [1, 16], strides = [1, 1]} : vector<1x64xf32> to vector<1x16xf32>
    %106 = arith.negf %105 : vector<1x16xf32>
    %107 = math.exp %106 : vector<1x16xf32>
    %cst_27 = arith.constant 1.000000e+00 : f32
    %108 = vector.broadcast %cst_27 : f32 to vector<1x16xf32>
    %109 = arith.addf %108, %107 : vector<1x16xf32>
    %110 = arith.divf %108, %109 : vector<1x16xf32>
    %111 = vector.extract_strided_slice %98 {offsets = [0, 32], sizes = [1, 16], strides = [1, 1]} : vector<1x64xf32> to vector<1x16xf32>
    %112 = math.tanh %111 : vector<1x16xf32>
    %113 = vector.extract_strided_slice %98 {offsets = [0, 48], sizes = [1, 16], strides = [1, 1]} : vector<1x64xf32> to vector<1x16xf32>
    %114 = arith.negf %113 : vector<1x16xf32>
    %115 = math.exp %114 : vector<1x16xf32>
    %cst_28 = arith.constant 1.000000e+00 : f32
    %116 = vector.broadcast %cst_28 : f32 to vector<1x16xf32>
    %117 = arith.addf %116, %115 : vector<1x16xf32>
    %118 = arith.divf %116, %117 : vector<1x16xf32>
    %119 = arith.mulf %110, %92 : vector<1x16xf32>
    %120 = arith.mulf %104, %112 : vector<1x16xf32>
    %121 = arith.addf %119, %120 : vector<1x16xf32>
    %122 = math.tanh %121 : vector<1x16xf32>
    %123 = arith.mulf %118, %122 : vector<1x16xf32>
    %c3 = arith.constant 3 : index
    %c0_29 = arith.constant 0 : index
    %124 = vector.load %arg16[%c3, %c0_29] : memref<8x16xf32, #tpu.memory_space<vmem>>, vector<1x16xf32>
    tpu.vector_store %arg16[%c3, %c0_29], %123 {strides = array<i32>} : memref<8x16xf32, #tpu.memory_space<vmem>>, vector<1x16xf32>,
    %125 = vector.extract_strided_slice %5 {offsets = [4, 0], sizes = [1, 64], strides = [1, 1]} : vector<8x64xf32> to vector<1x64xf32>
    %cst_30 = arith.constant dense<0.000000e+00> : vector<1x64xf32>
    %126 = tpu.matmul %123, %6, %cst_30 {dimension_numbers = #tpu.dot_dimension_numbers<[1], [0], [0], [1], [0, 0, 1, 1], [], []>} : vector<1x16xf32>, vector<16x64xf32>, vector<1x64xf32> -> vector<1x64xf32>
    %127 = arith.addf %125, %126 : vector<1x64xf32>
    %128 = vector.extract_strided_slice %127 {offsets = [0, 0], sizes = [1, 16], strides = [1, 1]} : vector<1x64xf32> to vector<1x16xf32>
    %129 = arith.negf %128 : vector<1x16xf32>
    %130 = math.exp %129 : vector<1x16xf32>
    %cst_31 = arith.constant 1.000000e+00 : f32
    %131 = vector.broadcast %cst_31 : f32 to vector<1x16xf32>
    %132 = arith.addf %131, %130 : vector<1x16xf32>
    %133 = arith.divf %131, %132 : vector<1x16xf32>
    %134 = vector.extract_strided_slice %127 {offsets = [0, 16], sizes = [1, 16], strides = [1, 1]} : vector<1x64xf32> to vector<1x16xf32>
    %135 = arith.negf %134 : vector<1x16xf32>
    %136 = math.exp %135 : vector<1x16xf32>
    %cst_32 = arith.constant 1.000000e+00 : f32
    %137 = vector.broadcast %cst_32 : f32 to vector<1x16xf32>
    %138 = arith.addf %137, %136 : vector<1x16xf32>
    %139 = arith.divf %137, %138 : vector<1x16xf32>
    %140 = vector.extract_strided_slice %127 {offsets = [0, 32], sizes = [1, 16], strides = [1, 1]} : vector<1x64xf32> to vector<1x16xf32>
    %141 = math.tanh %140 : vector<1x16xf32>
    %142 = vector.extract_strided_slice %127 {offsets = [0, 48], sizes = [1, 16], strides = [1, 1]} : vector<1x64xf32> to vector<1x16xf32>
    %143 = arith.negf %142 : vector<1x16xf32>
    %144 = math.exp %143 : vector<1x16xf32>
    %cst_33 = arith.constant 1.000000e+00 : f32
    %145 = vector.broadcast %cst_33 : f32 to vector<1x16xf32>
    %146 = arith.addf %145, %144 : vector<1x16xf32>
    %147 = arith.divf %145, %146 : vector<1x16xf32>
    %148 = arith.mulf %139, %121 : vector<1x16xf32>
    %149 = arith.mulf %133, %141 : vector<1x16xf32>
    %150 = arith.addf %148, %149 : vector<1x16xf32>
    %151 = math.tanh %150 : vector<1x16xf32>
    %152 = arith.mulf %147, %151 : vector<1x16xf32>
    %c4 = arith.constant 4 : index
    %c0_34 = arith.constant 0 : index
    %153 = vector.load %arg16[%c4, %c0_34] : memref<8x16xf32, #tpu.memory_space<vmem>>, vector<1x16xf32>
    tpu.vector_store %arg16[%c4, %c0_34], %152 {strides = array<i32>} : memref<8x16xf32, #tpu.memory_space<vmem>>, vector<1x16xf32>,
    %154 = vector.extract_strided_slice %5 {offsets = [5, 0], sizes = [1, 64], strides = [1, 1]} : vector<8x64xf32> to vector<1x64xf32>
    %cst_35 = arith.constant dense<0.000000e+00> : vector<1x64xf32>
    %155 = tpu.matmul %152, %6, %cst_35 {dimension_numbers = #tpu.dot_dimension_numbers<[1], [0], [0], [1], [0, 0, 1, 1], [], []>} : vector<1x16xf32>, vector<16x64xf32>, vector<1x64xf32> -> vector<1x64xf32>
    %156 = arith.addf %154, %155 : vector<1x64xf32>
    %157 = vector.extract_strided_slice %156 {offsets = [0, 0], sizes = [1, 16], strides = [1, 1]} : vector<1x64xf32> to vector<1x16xf32>
    %158 = arith.negf %157 : vector<1x16xf32>
    %159 = math.exp %158 : vector<1x16xf32>
    %cst_36 = arith.constant 1.000000e+00 : f32
    %160 = vector.broadcast %cst_36 : f32 to vector<1x16xf32>
    %161 = arith.addf %160, %159 : vector<1x16xf32>
    %162 = arith.divf %160, %161 : vector<1x16xf32>
    %163 = vector.extract_strided_slice %156 {offsets = [0, 16], sizes = [1, 16], strides = [1, 1]} : vector<1x64xf32> to vector<1x16xf32>
    %164 = arith.negf %163 : vector<1x16xf32>
    %165 = math.exp %164 : vector<1x16xf32>
    %cst_37 = arith.constant 1.000000e+00 : f32
    %166 = vector.broadcast %cst_37 : f32 to vector<1x16xf32>
    %167 = arith.addf %166, %165 : vector<1x16xf32>
    %168 = arith.divf %166, %167 : vector<1x16xf32>
    %169 = vector.extract_strided_slice %156 {offsets = [0, 32], sizes = [1, 16], strides = [1, 1]} : vector<1x64xf32> to vector<1x16xf32>
    %170 = math.tanh %169 : vector<1x16xf32>
    %171 = vector.extract_strided_slice %156 {offsets = [0, 48], sizes = [1, 16], strides = [1, 1]} : vector<1x64xf32> to vector<1x16xf32>
    %172 = arith.negf %171 : vector<1x16xf32>
    %173 = math.exp %172 : vector<1x16xf32>
    %cst_38 = arith.constant 1.000000e+00 : f32
    %174 = vector.broadcast %cst_38 : f32 to vector<1x16xf32>
    %175 = arith.addf %174, %173 : vector<1x16xf32>
    %176 = arith.divf %174, %175 : vector<1x16xf32>
    %177 = arith.mulf %168, %150 : vector<1x16xf32>
    %178 = arith.mulf %162, %170 : vector<1x16xf32>
    %179 = arith.addf %177, %178 : vector<1x16xf32>
    %180 = math.tanh %179 : vector<1x16xf32>
    %181 = arith.mulf %176, %180 : vector<1x16xf32>
    %c5 = arith.constant 5 : index
    %c0_39 = arith.constant 0 : index
    %182 = vector.load %arg16[%c5, %c0_39] : memref<8x16xf32, #tpu.memory_space<vmem>>, vector<1x16xf32>
    tpu.vector_store %arg16[%c5, %c0_39], %181 {strides = array<i32>} : memref<8x16xf32, #tpu.memory_space<vmem>>, vector<1x16xf32>,
    %183 = vector.extract_strided_slice %5 {offsets = [6, 0], sizes = [1, 64], strides = [1, 1]} : vector<8x64xf32> to vector<1x64xf32>
    %cst_40 = arith.constant dense<0.000000e+00> : vector<1x64xf32>
    %184 = tpu.matmul %181, %6, %cst_40 {dimension_numbers = #tpu.dot_dimension_numbers<[1], [0], [0], [1], [0, 0, 1, 1], [], []>} : vector<1x16xf32>, vector<16x64xf32>, vector<1x64xf32> -> vector<1x64xf32>
    %185 = arith.addf %183, %184 : vector<1x64xf32>
    %186 = vector.extract_strided_slice %185 {offsets = [0, 0], sizes = [1, 16], strides = [1, 1]} : vector<1x64xf32> to vector<1x16xf32>
    %187 = arith.negf %186 : vector<1x16xf32>
    %188 = math.exp %187 : vector<1x16xf32>
    %cst_41 = arith.constant 1.000000e+00 : f32
    %189 = vector.broadcast %cst_41 : f32 to vector<1x16xf32>
    %190 = arith.addf %189, %188 : vector<1x16xf32>
    %191 = arith.divf %189, %190 : vector<1x16xf32>
    %192 = vector.extract_strided_slice %185 {offsets = [0, 16], sizes = [1, 16], strides = [1, 1]} : vector<1x64xf32> to vector<1x16xf32>
    %193 = arith.negf %192 : vector<1x16xf32>
    %194 = math.exp %193 : vector<1x16xf32>
    %cst_42 = arith.constant 1.000000e+00 : f32
    %195 = vector.broadcast %cst_42 : f32 to vector<1x16xf32>
    %196 = arith.addf %195, %194 : vector<1x16xf32>
    %197 = arith.divf %195, %196 : vector<1x16xf32>
    %198 = vector.extract_strided_slice %185 {offsets = [0, 32], sizes = [1, 16], strides = [1, 1]} : vector<1x64xf32> to vector<1x16xf32>
    %199 = math.tanh %198 : vector<1x16xf32>
    %200 = vector.extract_strided_slice %185 {offsets = [0, 48], sizes = [1, 16], strides = [1, 1]} : vector<1x64xf32> to vector<1x16xf32>
    %201 = arith.negf %200 : vector<1x16xf32>
    %202 = math.exp %201 : vector<1x16xf32>
    %cst_43 = arith.constant 1.000000e+00 : f32
    %203 = vector.broadcast %cst_43 : f32 to vector<1x16xf32>
    %204 = arith.addf %203, %202 : vector<1x16xf32>
    %205 = arith.divf %203, %204 : vector<1x16xf32>
    %206 = arith.mulf %197, %179 : vector<1x16xf32>
    %207 = arith.mulf %191, %199 : vector<1x16xf32>
    %208 = arith.addf %206, %207 : vector<1x16xf32>
    %209 = math.tanh %208 : vector<1x16xf32>
    %210 = arith.mulf %205, %209 : vector<1x16xf32>
    %c6 = arith.constant 6 : index
    %c0_44 = arith.constant 0 : index
    %211 = vector.load %arg16[%c6, %c0_44] : memref<8x16xf32, #tpu.memory_space<vmem>>, vector<1x16xf32>
    tpu.vector_store %arg16[%c6, %c0_44], %210 {strides = array<i32>} : memref<8x16xf32, #tpu.memory_space<vmem>>, vector<1x16xf32>,
    %212 = vector.extract_strided_slice %5 {offsets = [7, 0], sizes = [1, 64], strides = [1, 1]} : vector<8x64xf32> to vector<1x64xf32>
    %cst_45 = arith.constant dense<0.000000e+00> : vector<1x64xf32>
    %213 = tpu.matmul %210, %6, %cst_45 {dimension_numbers = #tpu.dot_dimension_numbers<[1], [0], [0], [1], [0, 0, 1, 1], [], []>} : vector<1x16xf32>, vector<16x64xf32>, vector<1x64xf32> -> vector<1x64xf32>
    %214 = arith.addf %212, %213 : vector<1x64xf32>
    %215 = vector.extract_strided_slice %214 {offsets = [0, 0], sizes = [1, 16], strides = [1, 1]} : vector<1x64xf32> to vector<1x16xf32>
    %216 = arith.negf %215 : vector<1x16xf32>
    %217 = math.exp %216 : vector<1x16xf32>
    %cst_46 = arith.constant 1.000000e+00 : f32
    %218 = vector.broadcast %cst_46 : f32 to vector<1x16xf32>
    %219 = arith.addf %218, %217 : vector<1x16xf32>
    %220 = arith.divf %218, %219 : vector<1x16xf32>
    %221 = vector.extract_strided_slice %214 {offsets = [0, 16], sizes = [1, 16], strides = [1, 1]} : vector<1x64xf32> to vector<1x16xf32>
    %222 = arith.negf %221 : vector<1x16xf32>
    %223 = math.exp %222 : vector<1x16xf32>
    %cst_47 = arith.constant 1.000000e+00 : f32
    %224 = vector.broadcast %cst_47 : f32 to vector<1x16xf32>
    %225 = arith.addf %224, %223 : vector<1x16xf32>
    %226 = arith.divf %224, %225 : vector<1x16xf32>
    %227 = vector.extract_strided_slice %214 {offsets = [0, 32], sizes = [1, 16], strides = [1, 1]} : vector<1x64xf32> to vector<1x16xf32>
    %228 = math.tanh %227 : vector<1x16xf32>
    %229 = vector.extract_strided_slice %214 {offsets = [0, 48], sizes = [1, 16], strides = [1, 1]} : vector<1x64xf32> to vector<1x16xf32>
    %230 = arith.negf %229 : vector<1x16xf32>
    %231 = math.exp %230 : vector<1x16xf32>
    %cst_48 = arith.constant 1.000000e+00 : f32
    %232 = vector.broadcast %cst_48 : f32 to vector<1x16xf32>
    %233 = arith.addf %232, %231 : vector<1x16xf32>
    %234 = arith.divf %232, %233 : vector<1x16xf32>
    %235 = arith.mulf %226, %208 : vector<1x16xf32>
    %236 = arith.mulf %220, %228 : vector<1x16xf32>
    %237 = arith.addf %235, %236 : vector<1x16xf32>
    %238 = math.tanh %237 : vector<1x16xf32>
    %239 = arith.mulf %234, %238 : vector<1x16xf32>
    %c7 = arith.constant 7 : index
    %c0_49 = arith.constant 0 : index
    %240 = vector.load %arg16[%c7, %c0_49] : memref<8x16xf32, #tpu.memory_space<vmem>>, vector<1x16xf32>
    tpu.vector_store %arg16[%c7, %c0_49], %239 {strides = array<i32>} : memref<8x16xf32, #tpu.memory_space<vmem>>, vector<1x16xf32>,
    %c0_50 = arith.constant 0 : index
    %c0_51 = arith.constant 0 : index
    %241 = vector.load %arg16[%c0_50, %c0_51] : memref<8x16xf32, #tpu.memory_space<vmem>>, vector<8x16xf32>
    %c0_52 = arith.constant 0 : index
    %c0_53 = arith.constant 0 : index
    %242 = vector.load %arg4[%c0_52, %c0_53] : memref<16x64xf32, #tpu.memory_space<vmem>>, vector<16x64xf32>
    %cst_54 = arith.constant dense<0.000000e+00> : vector<8x64xf32>
    %243 = tpu.matmul %241, %242, %cst_54 {dimension_numbers = #tpu.dot_dimension_numbers<[1], [0], [0], [1], [0, 0, 1, 1], [], []>} : vector<8x16xf32>, vector<16x64xf32>, vector<8x64xf32> -> vector<8x64xf32>
    %c0_55 = arith.constant 0 : index
    %c0_56 = arith.constant 0 : index
    %244 = vector.load %arg5[%c0_55, %c0_56] : memref<1x64xf32, #tpu.memory_space<vmem>>, vector<1x64xf32>
    %245 = vector.broadcast %244 : vector<1x64xf32> to vector<8x64xf32>
    %246 = arith.addf %243, %245 : vector<8x64xf32>
    %cst_57 = arith.constant 0.000000e+00 : f32
    %247 = vector.broadcast %cst_57 : f32 to vector<8x64xf32>
    %248 = arith.maximumf %246, %247 : vector<8x64xf32>
    %c0_58 = arith.constant 0 : index
    %c0_59 = arith.constant 0 : index
    %249 = vector.load %arg6[%c0_58, %c0_59] : memref<64x2xf32, #tpu.memory_space<vmem>>, vector<64x2xf32>
    %cst_60 = arith.constant dense<0.000000e+00> : vector<8x2xf32>
    %250 = tpu.matmul %248, %249, %cst_60 {dimension_numbers = #tpu.dot_dimension_numbers<[1], [0], [0], [1], [0, 0, 1, 1], [], []>} : vector<8x64xf32>, vector<64x2xf32>, vector<8x2xf32> -> vector<8x2xf32>
    %c0_61 = arith.constant 0 : index
    %c0_62 = arith.constant 0 : index
    %251 = vector.load %arg7[%c0_61, %c0_62] : memref<1x2xf32, #tpu.memory_space<vmem>>, vector<1x2xf32>
    %252 = vector.broadcast %251 : vector<1x2xf32> to vector<8x2xf32>
    %253 = arith.addf %250, %252 : vector<8x2xf32>
    %cst_63 = arith.constant dense<0xFF800000> : vector<2xf32>
    %254 = vector.multi_reduction <maximumf>, %253, %cst_63 [0] : vector<8x2xf32> to vector<2xf32>
    %255 = vector.shape_cast %254 : vector<2xf32> to vector<1x2xf32>
    %256 = vector.broadcast %255 : vector<1x2xf32> to vector<8x2xf32>
    %257 = arith.subf %253, %256 : vector<8x2xf32>
    %258 = math.exp %257 : vector<8x2xf32>
    %cst_64 = arith.constant dense<0.000000e+00> : vector<2xf32>
    %259 = vector.multi_reduction <add>, %258, %cst_64 [0] : vector<8x2xf32> to vector<2xf32>
    %260 = vector.shape_cast %259 : vector<2xf32> to vector<1x2xf32>
    %261 = tpu.reciprocal %260 {approx = true} : vector<1x2xf32> -> vector<1x2xf32>
    %262 = vector.broadcast %261 : vector<1x2xf32> to vector<8x2xf32>
    %263 = arith.mulf %258, %262 : vector<8x2xf32>
    %cst_65 = arith.constant dense<0.000000e+00> : vector<2x16xf32>
    %264 = tpu.matmul %263, %241, %cst_65 {dimension_numbers = #tpu.dot_dimension_numbers<[0], [0], [1], [1], [0, 1, 1, 1], [], []>} : vector<8x2xf32>, vector<8x16xf32>, vector<2x16xf32> -> vector<2x16xf32>
    %c0_66 = arith.constant 0 : index
    %c0_67 = arith.constant 0 : index
    %265 = vector.load %arg8[%c0_66, %c0_67] : memref<8x16xf32, #tpu.memory_space<vmem>>, vector<8x16xf32>
    %c0_68 = arith.constant 0 : index
    %c0_69 = arith.constant 0 : index
    %266 = vector.load %arg9[%c0_68, %c0_69] : memref<16x640xf32, #tpu.memory_space<vmem>>, vector<16x640xf32>
    %cst_70 = arith.constant dense<0.000000e+00> : vector<8x640xf32>
    %267 = tpu.matmul %265, %266, %cst_70 {dimension_numbers = #tpu.dot_dimension_numbers<[1], [0], [0], [1], [0, 0, 1, 1], [], []>} : vector<8x16xf32>, vector<16x640xf32>, vector<8x640xf32> -> vector<8x640xf32>
    %c0_71 = arith.constant 0 : index
    %c0_72 = arith.constant 0 : index
    %268 = vector.load %arg10[%c0_71, %c0_72] : memref<1x640xf32, #tpu.memory_space<vmem>>, vector<1x640xf32>
    %269 = vector.broadcast %268 : vector<1x640xf32> to vector<8x640xf32>
    %270 = arith.addf %267, %269 : vector<8x640xf32>
    %271 = vector.extract_strided_slice %264 {offsets = [0, 0], sizes = [1, 16], strides = [1, 1]} : vector<2x16xf32> to vector<1x16xf32>
    %c0_73 = arith.constant 0 : index
    %c0_74 = arith.constant 0 : index
    %272 = vector.load %arg11[%c0_73, %c0_74] : memref<32x640xf32, #tpu.memory_space<vmem>>, vector<16x640xf32>
    %cst_75 = arith.constant dense<0.000000e+00> : vector<1x640xf32>
    %273 = tpu.matmul %271, %272, %cst_75 {dimension_numbers = #tpu.dot_dimension_numbers<[1], [0], [0], [1], [0, 0, 1, 1], [], []>} : vector<1x16xf32>, vector<16x640xf32>, vector<1x640xf32> -> vector<1x640xf32>
    %274 = vector.extract_strided_slice %264 {offsets = [1, 0], sizes = [1, 16], strides = [1, 1]} : vector<2x16xf32> to vector<1x16xf32>
    %c16 = arith.constant 16 : index
    %c0_76 = arith.constant 0 : index
    %275 = vector.load %arg11[%c16, %c0_76] : memref<32x640xf32, #tpu.memory_space<vmem>>, vector<16x640xf32>
    %cst_77 = arith.constant dense<0.000000e+00> : vector<1x640xf32>
    %276 = tpu.matmul %274, %275, %cst_77 {dimension_numbers = #tpu.dot_dimension_numbers<[1], [0], [0], [1], [0, 0, 1, 1], [], []>} : vector<1x16xf32>, vector<16x640xf32>, vector<1x640xf32> -> vector<1x640xf32>
    %277 = arith.addf %273, %276 : vector<1x640xf32>
    %c0_78 = arith.constant 0 : index
    %c0_79 = arith.constant 0 : index
    %278 = vector.load %arg12[%c0_78, %c0_79] : memref<1x640xf32, #tpu.memory_space<vmem>>, vector<1x640xf32>
    %279 = arith.addf %277, %278 : vector<1x640xf32>
    %280 = vector.broadcast %279 : vector<1x640xf32> to vector<8x640xf32>
    %281 = arith.mulf %270, %280 : vector<8x640xf32>
    %282 = vector.extract_strided_slice %281 {offsets = [0, 0], sizes = [8, 128], strides = [1, 1]} : vector<8x640xf32> to vector<8x128xf32>
    %283 = vector.extract_strided_slice %281 {offsets = [0, 128], sizes = [8, 128], strides = [1, 1]} : vector<8x640xf32> to vector<8x128xf32>
    %284 = arith.addf %282, %283 : vector<8x128xf32>
    %285 = vector.extract_strided_slice %281 {offsets = [0, 256], sizes = [8, 128], strides = [1, 1]} : vector<8x640xf32> to vector<8x128xf32>
    %286 = arith.addf %284, %285 : vector<8x128xf32>
    %287 = vector.extract_strided_slice %281 {offsets = [0, 384], sizes = [8, 128], strides = [1, 1]} : vector<8x640xf32> to vector<8x128xf32>
    %288 = arith.addf %286, %287 : vector<8x128xf32>
    %289 = vector.extract_strided_slice %281 {offsets = [0, 512], sizes = [8, 128], strides = [1, 1]} : vector<8x640xf32> to vector<8x128xf32>
    %290 = arith.addf %288, %289 : vector<8x128xf32>
    %cst_80 = arith.constant 0.000000e+00 : f32
    %291 = vector.broadcast %cst_80 : f32 to vector<8x128xf32>
    %292 = arith.maximumf %290, %291 : vector<8x128xf32>
    %293 = math.sqrt %292 : vector<8x128xf32>
    %cst_81 = arith.constant 0.000000e+00 : f32
    %294 = vector.broadcast %cst_81 : f32 to vector<8x128xf32>
    %295 = arith.subf %294, %290 : vector<8x128xf32>
    %cst_82 = arith.constant 0.000000e+00 : f32
    %296 = vector.broadcast %cst_82 : f32 to vector<8x128xf32>
    %297 = arith.maximumf %295, %296 : vector<8x128xf32>
    %298 = math.sqrt %297 : vector<8x128xf32>
    %299 = arith.subf %293, %298 : vector<8x128xf32>
    %300 = arith.mulf %299, %299 : vector<8x128xf32>
    %cst_83 = arith.constant dense<0.000000e+00> : vector<8xf32>
    %301 = vector.multi_reduction <add>, %300, %cst_83 [1] : vector<8x128xf32> to vector<8xf32>
    %302 = vector.shape_cast %301 : vector<8xf32> to vector<8x1xf32>
    %cst_84 = arith.constant 1.000000e-24 : f32
    %303 = vector.broadcast %cst_84 : f32 to vector<8x1xf32>
    %304 = arith.maximumf %302, %303 : vector<8x1xf32>
    %305 = math.rsqrt %304 : vector<8x1xf32>
    %306 = vector.broadcast %305 : vector<8x1xf32> to vector<8x128xf32>
    %307 = arith.mulf %299, %306 : vector<8x128xf32>
    %c0_85 = arith.constant 0 : index
    %c0_86 = arith.constant 0 : index
    %308 = vector.load %arg13[%c0_85, %c0_86] : memref<128x128xf32, #tpu.memory_space<vmem>>, vector<128x128xf32>
    %cst_87 = arith.constant dense<0.000000e+00> : vector<8x128xf32>
    %309 = tpu.matmul %307, %308, %cst_87 {dimension_numbers = #tpu.dot_dimension_numbers<[1], [0], [0], [1], [0, 0, 1, 1], [], []>} : vector<8x128xf32>, vector<128x128xf32>, vector<8x128xf32> -> vector<8x128xf32>
    %c0_88 = arith.constant 0 : index
    %c0_89 = arith.constant 0 : index
    %310 = vector.load %arg14[%c0_88, %c0_89] : memref<1x128xf32, #tpu.memory_space<vmem>>, vector<1x128xf32>
    %311 = vector.broadcast %310 : vector<1x128xf32> to vector<8x128xf32>
    %312 = arith.addf %309, %311 : vector<8x128xf32>
    %cst_90 = arith.constant dense<0xFF800000> : vector<8xf32>
    %313 = vector.multi_reduction <maximumf>, %312, %cst_90 [1] : vector<8x128xf32> to vector<8xf32>
    %314 = vector.shape_cast %313 : vector<8xf32> to vector<8x1xf32>
    %315 = vector.broadcast %314 : vector<8x1xf32> to vector<8x128xf32>
    %316 = arith.subf %312, %315 : vector<8x128xf32>
    %317 = math.exp %316 : vector<8x128xf32>
    %cst_91 = arith.constant dense<0.000000e+00> : vector<8xf32>
    %318 = vector.multi_reduction <add>, %317, %cst_91 [1] : vector<8x128xf32> to vector<8xf32>
    %319 = vector.shape_cast %318 : vector<8xf32> to vector<8x1xf32>
    %320 = tpu.reciprocal %319 {approx = true} : vector<8x1xf32> -> vector<8x1xf32>
    %321 = vector.broadcast %320 : vector<8x1xf32> to vector<8x128xf32>
    %322 = arith.mulf %317, %321 : vector<8x128xf32>
    %c0_92 = arith.constant 0 : index
    %c0_93 = arith.constant 0 : index
    %323 = vector.load %arg15[%c0_92, %c0_93] : memref<8x128xf32, #tpu.memory_space<vmem>>, vector<8x128xf32>
    tpu.vector_store %arg15[%c0_92, %c0_93], %322 {strides = array<i32>} : memref<8x128xf32, #tpu.memory_space<vmem>>, vector<8x128xf32>,
    return
  }
}

</mosaic_0001>

<bundles_post_ra>
// kernel: _lambda_.1
= control target key start
LH: loop header
LB: loop body
LE: loop exit
PB: predicated region body
PF: predicated region fallthrough
CT: control target
= control target key end

     0   :  { %20 = vsyncpa [#allocation4], 0  ;;  %s2110_s0 = inlined_call_operand.vmem [shape: f32[8,32], index: 0, kind: input, shape index: {}]   ;;  %s2111_s1 = inlined_call_operand.hbm [shape: f32[32,64], index: 1, kind: input, shape index: {}]   ;;  %s2112_s2 = inlined_call_operand.hbm [shape: f32[16,64], index: 2, kind: input, shape index: {}]   ;;  %s2113_s3 = inlined_call_operand.hbm [shape: f32[1,64], index: 3, kind: input, shape index: {}]   ;;  %s2114_s4 = inlined_call_operand.vmem [shape: f32[16,64], index: 4, kind: input, shape index: {}]   ;;  %s2115_s5 = inlined_call_operand.hbm [shape: f32[1,64], index: 5, kind: input, shape index: {}]   ;;  %s2116_s6 = inlined_call_operand.hbm [shape: f32[64,2], index: 6, kind: input, shape index: {}]   ;;  %s2117_s7 = inlined_call_operand.hbm [shape: f32[1,2], index: 7, kind: input, shape index: {}]   ;;  %s2118_s8 = inlined_call_operand.vmem [shape: f32[8,16], index: 8, kind: input, shape index: {}]   ;;  %s2119_s9 = inlined_call_operand.hbm [shape: f32[16,640], index: 9, kind: input, shape index: {}]   ;;  %s2120_s10 = inlined_call_operand.vmem [shape: f32[1,640], index: 10, kind: input, shape index: {}]   ;;  %s2121_s11 = inlined_call_operand.hbm [shape: f32[32,640], index: 11, kind: input, shape index: {}]   ;;  %s2122_s12 = inlined_call_operand.vmem [shape: f32[1,640], index: 12, kind: input, shape index: {}]   ;;  %s2123_s13 = inlined_call_operand.hbm [shape: f32[128,128], index: 13, kind: input, shape index: {}]   ;;  %s2124_s14 = inlined_call_operand.vmem [shape: f32[1,128], index: 14, kind: input, shape index: {}]   ;;  %s2125_s15 = inlined_call_operand.hbm [shape: f32[8,128], index: 15, kind: output, shape index: {}]  }
   0x1   :  { %21 = vsyncpa [#allocation7], 0 }
   0x2   :  { %22 = vsyncpa [#allocation10], 0 }
   0x3   :  { %23 = vsyncpa [#allocation13], 0 }
   0x4   :  { %24 = vsyncpa [#allocation16], 0 }
   0x5   :  { %25 = vsyncpa [#allocation5], 0  ;;  %s45_s20 = sshll.u32 %s2112_s2, 4  ;;  %s1837_s21 = smov [#allocation6]   ;;  %s46_s20 = int_to_ptr.hbm [resolvable:$true] %s45_s20 }
   0x6   :  { %s47_s22 = sshll.u32 %s1837_s21, 4  ;;  %s72_s25 = sshll.u32 %s2115_s5, 4  ;;  %s48_s22 = int_to_ptr.vmem [resolvable:$true] %s47_s22  ;;  %s73_s25 = int_to_ptr.hbm [resolvable:$true] %s72_s25 }
   0x7   :  { %s1838_s26 = smov 128   ;;  %s1839_s27 = smov 8  }
   0x8   :  { %53 = dma.hbm_to_vmem [thread:$0]  %s46_s20, 256, %s48_s22, [#allocation7], %s1838_s26, %s1838_s26, %s1839_s27  }
   0x9   :  { %s1840_s28 = smov [#allocation9]   ;;  %s96_s2 = sshll.u32 %s2117_s7, 4  ;;  %s97_s2 = int_to_ptr.hbm [resolvable:$true] %s96_s2 }
   0xa   :  { %s74_s29 = sshll.u32 %s1840_s28, 4  ;;  %s1841_s17 = smov [#allocation12]   ;;  %s75_s29 = int_to_ptr.vmem [resolvable:$true] %s74_s29 }
   0xb   :  { %77 = dma.hbm_to_vmem [thread:$0]  %s73_s25, 16, %s75_s29, [#allocation10]  }
   0xc   :  { %s98_s18 = sshll.u32 %s1841_s17, 4  ;;  %s123_s21 = sshll.u32 %s2121_s11, 4  ;;  %s99_s18 = int_to_ptr.vmem [resolvable:$true] %s98_s18  ;;  %s124_s21 = int_to_ptr.hbm [resolvable:$true] %s123_s21 }
   0xd   :  { %101 = dma.hbm_to_vmem [thread:$0]  %s97_s2, 16, %s99_s18, [#allocation13]  }
   0xe   :  { %s1842_s20 = smov [#allocation15]   ;;  %s32_s28 = sshll.u32 %s2111_s1, 4  ;;  %s33_s28 = int_to_ptr.hbm [resolvable:$true] %s32_s28 }
   0xf   :  { %s125_s22 = sshll.u32 %s1842_s20, 4  ;;  %s1843_s7 = smov 640   ;;  %s126_s22 = int_to_ptr.vmem [resolvable:$true] %s125_s22 }
  0x10   :  { %s1844_s30 = smov 40   ;;  %s59_s16 = sshll.u32 %s2113_s3, 4  ;;  %s60_s16 = int_to_ptr.hbm [resolvable:$true] %s59_s16 }
  0x11   :  { %131 = dma.hbm_to_vmem [thread:$0]  %s124_s21, 2560, %s126_s22, [#allocation16], %s1843_s7, %s1843_s7, %s1844_s30  }
  0x12   :  { %s1845_s17 = smov [#allocation3]   ;;  %s1846_s11 = smov [#allocation8]  }
  0x13   :  { %s34_s5 = sshll.u32 %s1845_s17, 4  ;;  %s61_s2 = sshll.u32 %s1846_s11, 4  ;;  %s35_s5 = int_to_ptr.vmem [resolvable:$true] %s34_s5  ;;  %s62_s2 = int_to_ptr.vmem [resolvable:$true] %s61_s2 }
  0x14   :  { %40 = dma.hbm_to_vmem [thread:$0]  %s33_s28, 512, %s35_s5, [#allocation4], %s1838_s26, %s1838_s26, %s1839_s27  }
  0x15   :  { %s82_s19 = sshll.u32 %s2116_s6, 4  ;;  %s108_s3 = sshll.u32 %s2119_s9, 4  ;;  %s83_s19 = int_to_ptr.hbm [resolvable:$true] %s82_s19  ;;  %s109_s3 = int_to_ptr.hbm [resolvable:$true] %s108_s3 }
  0x16   :  { %64 = dma.hbm_to_vmem [thread:$0]  %s60_s16, 16, %s62_s2, [#allocation7]  }
  0x17   :  { %s1847_s22 = smov [#allocation11]   ;;  %s1848_s24 = smov [#allocation14]  }
  0x18   :  { %s84_s23 = sshll.u32 %s1847_s22, 4  ;;  %s110_s28 = sshll.u32 %s1848_s24, 4  ;;  %s85_s23 = int_to_ptr.vmem [resolvable:$true] %s84_s23  ;;  %s111_s28 = int_to_ptr.vmem [resolvable:$true] %s110_s28 }
  0x19   :  { %90 = dma.hbm_to_vmem [thread:$0]  %s83_s19, 1024, %s85_s23, [#allocation10], %s1838_s26, %s1838_s26, %s1839_s27  }
  0x1a   :  { %s138_s6 = sshll.u32 %s2123_s13, 4  ;;  %s1849_s16 = smov [#allocation17]   ;;  %s139_s6 = int_to_ptr.hbm [resolvable:$true] %s138_s6 }
  0x1b   :  { %116 = dma.hbm_to_vmem [thread:$0]  %s109_s3, 1280, %s111_s28, [#allocation13], %s1843_s7, %s1843_s7, %s1844_s30  }
  0x1c   :  { %s140_s17 = sshll.u32 %s1849_s16, 4  ;;  %s141_s17 = int_to_ptr.vmem [resolvable:$true] %s140_s17 }
  0x1d   :  { %146 = dma.hbm_to_vmem [thread:$0]  %s139_s6, 2048, %s141_s17, [#allocation16], %s1838_s26, %s1838_s26, %s1839_s27  }
  0x1e   :  { %1825 = dma.done.wait [#allocation4], 512  }
  0x1f   :  { %1826 = vsyncadd [#allocation4], 4294966784 }
  0x20   :  { %1827 = dma.done.wait [#allocation7], 272  }
  0x21   :  { %1828 = vsyncadd [#allocation7], 4294967024 }
  0x22   :  { %1829 = dma.done.wait [#allocation10], 1040  }
  0x23   :  { %1830 = vsyncadd [#allocation10], 4294966256 }
  0x24   :  { %1831 = dma.done.wait [#allocation13], 1296  }
  0x25   :  { %1832 = vsyncadd [#allocation13], 4294966000 }
  0x26   :  { %1833 = dma.done.wait [#allocation16], 4608  }
  0x27   :  { %1834 = vsyncadd [#allocation16], 4294962688  ;;  %v189_v0 = vld [vmem:[#allocation3 + $0x18] sm:$0xff]  ;;  %v1975_v1 = vld [vmem:[#allocation6 + $0x8] sm:$0xff]  ;;  %v1850_v5 = vmov 0.0   ;;  %vm194_vm0 = vcmask 261120  }
  0x28   :  { %v188_v2 = vld [vmem:[#allocation3 + $0x10] sm:$0xff]  ;;  %210 = vmatpush.msra.mxu0 %v189_v0  ;;  %238 = vmatpush.msra.mxu2 %v1975_v1  ;;  %v1978_v3 = vld [vmem:[#allocation6] sm:$0xff]  ;;  %v187_v4 = vld [vmem:[#allocation3 + $0x8] sm:$0xff]  ;;  %s1852_s26 = smov 16   ;;  %s1853_s27 = smov 32   ;;  %vm286_vm5 = vcmask 122880  }
  0x29   :  { %379 = vmatpush.msra.mxu3 %v1975_v1  ;;  %v186_v6 = vld [vmem:[#allocation3] sm:$0xff]  ;;  %v185_v7 = vld [vmem:[%s2110_s0] sm:$0xff]  ;;  %v1503_v8 = vld [vmem:[#allocation8] ss:$0 sm:$0xff]  ;;  %s1851_s0 = smov 96   ;;  %s1854_s7 = smov 80  }
  0x2a   :  { %211 = vmatpush.msra.mxu0 %v188_v2  ;;  %239 = vmatpush.msra.mxu2 %v1978_v3  ;;  %vm220_vm6 = vcmask 130048   ;;  %s1855_s20 = smov [#allocation18]   ;;  %s1436_s24 = sshll.u32 %s2125_s15, 4  ;;  %s1437_s24 = int_to_ptr.hbm [resolvable:$true] %s1436_s24 }
  0x2b   :  { %240 = vmatmul.f32.vlgmr.msra.gmra.mxu2 %v1850_v5  ;;  %380 = vmatpush.msra.mxu3 %v1978_v3  ;;  %s1434_s3 = sshll.u32 %s1855_s20, 4  ;;  %s1435_s3 = int_to_ptr.vmem [resolvable:$true] %s1434_s3 }
  0x2c   :  { %212 = vmatpush.msra.mxu0 %v187_v4  ;;  %304 = vmatpush.msrb.mxu2 %v1975_v1 }
  0x2d   :  { %454 = vmatpush.msrb.mxu3 %v1975_v1 }
  0x2e   :  { %213 = vmatpush.msra.mxu0 %v186_v6  ;;  %305 = vmatpush.msrb.mxu2 %v1978_v3 }
  0x2f   :  { %1450 = vmatmul.msk.f32.vlgmr.msra.gmra.mxu0 %vm194_vm0, %v185_v7  ;;  %455 = vmatpush.msrb.mxu3 %v1978_v3 }
  0x30   :  { %529 = vmatpush.msra.mxu2 %v1975_v1  ;;  %679 = vmatpush.msrb.mxu0 %v1975_v1 }
  0x32   :  { %530 = vmatpush.msra.mxu2 %v1978_v3  ;;  %680 = vmatpush.msrb.mxu0 %v1978_v3 }
  0x34   :  { %754 = vmatpush.msra.mxu0 %v1975_v1 }
  0x36   :  { %755 = vmatpush.msra.mxu0 %v1978_v3 }
  0xac   :  { %v215_v9 = vpop.f32.mrf.mxu0 }
  0xad   :  { %v1996_v10 = vadd.f32 %v1503_v8, %v215_v9 }
  0xae   :  { %v241_v11 = vpop.f32.mrf.mxu2 }
  0xaf   :  { %v244_v12 = vadd.f32 %v241_v11, %v1996_v10 }
  0xb1   :  { %1507 = vtanh.f32 %v244_v12  ;;  %v1451_v14 = vmul.f32 -1.442695, %v244_v12 }
  0xb3   :  { %1509 = vpow2.f32 %v1451_v14 }
  0xb7   :  { %v1508_v13 = vpop.eup %1507 }
  0xb8   :  { %267 = vrot.lane.b32.xlu0 %v1508_v13, %s1851_s0 }
  0xb9   :  { %v1510_v15 = vpop.eup %1509 }
  0xba   :  { %v248_v16 = vadd.f32 1.0, %v1510_v15 }
  0xbc   :  { %1511 = vrcp.f32 %v248_v16  ;;  %v260_v22 = vand.u32 2147483648, %v248_v16  ;;  %vm254_vm2 = vweird.f32 %v248_v16  ;;  %v258_v23 = vand.u32 2147483647, %v248_v16 }
  0xbe   :  { %v261_v25 = vor.u32 1.1754944e-38, %v260_v22  ;;  %vm259_vm4 = vcmp.eq.f32.partialorder %v258_v23, 8.507059e+37 }
  0xc2   :  { %v1512_v17 = vpop.eup %1511 }
  0xc3   :  { %v250_v18 = vmul.f32 %v1512_v17, %v248_v16  ;;  %vm255_vm1 = vweird.f32 %v1512_v17 }
  0xc4   :  { %vm256_vm3 = vmor %vm254_vm2, %vm255_vm1 }
  0xc5   :  { %v251_v19 = vsub.f32 1.0, %v250_v18 }
  0xc7   :  { %v252_v20 = vmul.f32 %v1512_v17, %v251_v19 }
  0xc9   :  { %v253_v21 = vadd.f32 %v1512_v17, %v252_v20 }
  0xcb   :  { %v257_v24 = vsel %vm256_vm3, %v1512_v17, %v253_v21 }
  0xcc   :  { %v262_v27 = vsel %vm259_vm4, %v261_v25, %v257_v24 }
  0xcd   :  { %v265_v29 = vmul.f32 0.0, %v262_v27 }
 0x12a   :  { %v268_v26 = vpop.permute.xlu0 %267 }
 0x12b   :  { %v270_v28 = vmul.f32 %v268_v26, %v262_v27 }
 0x12d   :  { %272 = vrot.lane.b32.xlu0 %v270_v28, %s1852_s26 }
 0x19f   :  { %v273_v30 = vpop.permute.xlu0 %272 }
 0x1a0   :  { %v275_v31 = vadd.f32 %v273_v30, %v265_v29 }
 0x1a2   :  { %1513 = vtanh.f32 %v275_v31  ;;  %v335_v55 = vrot.slane %v275_v31, 7 }
 0x1a8   :  { %v1514_v32 = vpop.eup %1513 }
 0x1a9   :  { %278 = vrot.lane.b32.xlu1 %v1514_v32, %s1853_s27 }
 0x21b   :  { %v279_v33 = vpop.permute.xlu1 %278 }
 0x21c   :  { %v281_v34 = vmul.f32 %v279_v33, %v262_v27 }
 0x21e   :  { %283 = vrot.lane.b32.xlu1 %v281_v34, %s1854_s7 }
 0x290   :  { %v284_v35 = vpop.permute.xlu1 %283 }
 0x291   :  { %287 = vst.msk [vmem:[#allocation2] sm:$0x1] %vm286_vm5, %v284_v35  ;;  %1452 = vmatmul.msk.f32.vlgmr.msrb.gmra.mxu2 %vm220_vm6, %v284_v35 }
 0x314   :  { %v307_v36 = vpop.f32.mrf.mxu2 }
 0x315   :  { %v311_v37 = vrot.slane %v307_v36, 7 }
 0x317   :  { %v313_v38 = vadd.f32 %v311_v37, %v1996_v10 }
 0x319   :  { %1515 = vtanh.f32 %v313_v38  ;;  %v1453_v40 = vmul.f32 -1.442695, %v313_v38 }
 0x31b   :  { %1517 = vpow2.f32 %v1453_v40 }
 0x31f   :  { %v1516_v39 = vpop.eup %1515 }
 0x320   :  { %339 = vrot.lane.b32.xlu2 %v1516_v39, %s1851_s0 }
 0x321   :  { %v1518_v41 = vpop.eup %1517 }
 0x322   :  { %v317_v42 = vadd.f32 1.0, %v1518_v41 }
 0x324   :  { %1519 = vrcp.f32 %v317_v42  ;;  %v329_v48 = vand.u32 2147483648, %v317_v42  ;;  %vm323_vm8 = vweird.f32 %v317_v42  ;;  %v327_v49 = vand.u32 2147483647, %v317_v42 }
 0x326   :  { %v330_v51 = vor.u32 1.1754944e-38, %v329_v48  ;;  %vm328_vm10 = vcmp.eq.f32.partialorder %v327_v49, 8.507059e+37 }
 0x32a   :  { %v1520_v43 = vpop.eup %1519 }
 0x32b   :  { %v319_v44 = vmul.f32 %v1520_v43, %v317_v42  ;;  %vm324_vm7 = vweird.f32 %v1520_v43 }
 0x32c   :  { %vm325_vm9 = vmor %vm323_vm8, %vm324_vm7 }
 0x32d   :  { %v320_v45 = vsub.f32 1.0, %v319_v44 }
 0x32f   :  { %v321_v46 = vmul.f32 %v1520_v43, %v320_v45 }
 0x331   :  { %v322_v47 = vadd.f32 %v1520_v43, %v321_v46 }
 0x333   :  { %v326_v50 = vsel %vm325_vm9, %v1520_v43, %v322_v47 }
 0x334   :  { %v331_v53 = vsel %vm328_vm10, %v330_v51, %v326_v50 }
 0x335   :  { %v337_v56 = vmul.f32 %v335_v55, %v331_v53 }
 0x37a   :  { %v340_v52 = vpop.permute.xlu2 %339 }
 0x37b   :  { %v342_v54 = vmul.f32 %v340_v52, %v331_v53 }
 0x37d   :  { %344 = vrot.lane.b32.xlu2 %v342_v54, %s1852_s26 }
 0x3d7   :  { %v345_v57 = vpop.permute.xlu2 %344 }
 0x3d8   :  { %v347_v58 = vadd.f32 %v345_v57, %v337_v56 }
 0x3da   :  { %1521 = vtanh.f32 %v347_v58  ;;  %v410_v20 = vrot.slane %v347_v58, 7 }
 0x3e0   :  { %v1522_v59 = vpop.eup %1521 }
 0x3e1   :  { %350 = vrot.lane.b32.xlu0 %v1522_v59, %s1853_s27 }
 0x453   :  { %v351_v60 = vpop.permute.xlu0 %350 }
 0x454   :  { %v2008_v61 = vmul.f32 %v351_v60, %v331_v53 }
 0x456   :  { %v360_v62 = vrot.slane %v2008_v61, 1 }
 0x458   :  { %361 = vrot.lane.b32.xlu1 %v360_v62, %s1854_s7 }
 0x4ca   :  { %v362_v63 = vpop.permute.xlu1 %361 }
 0x4cb   :  { %1454 = vmatmul.msk.f32.vlgmr.msra.gmra.mxu3 %vm220_vm6, %v362_v63 }
 0x4cc   :  { %604 = vmatpush.msra.mxu3 %v1975_v1 }
 0x4ce   :  { %605 = vmatpush.msra.mxu3 %v1978_v3 }
 0x54e   :  { %v382_v0 = vpop.f32.mrf.mxu3 }
 0x54f   :  { %v386_v2 = vrot.slane %v382_v0, 6 }
 0x551   :  { %v388_v4 = vadd.f32 %v386_v2, %v1996_v10 }
 0x553   :  { %1523 = vtanh.f32 %v388_v4  ;;  %v1455_v6 = vmul.f32 -1.442695, %v388_v4 }
 0x555   :  { %1525 = vpow2.f32 %v1455_v6 }
 0x559   :  { %v1524_v5 = vpop.eup %1523 }
 0x55a   :  { %414 = vrot.lane.b32.xlu2 %v1524_v5, %s1851_s0 }
 0x55b   :  { %v1526_v7 = vpop.eup %1525 }
 0x55c   :  { %v392_v8 = vadd.f32 1.0, %v1526_v7 }
 0x55e   :  { %1527 = vrcp.f32 %v392_v8  ;;  %v404_v3 = vand.u32 2147483648, %v392_v8  ;;  %vm398_vm12 = vweird.f32 %v392_v8  ;;  %v402_v14 = vand.u32 2147483647, %v392_v8 }
 0x560   :  { %v405_v16 = vor.u32 1.1754944e-38, %v404_v3  ;;  %vm403_vm14 = vcmp.eq.f32.partialorder %v402_v14, 8.507059e+37 }
 0x564   :  { %v1528_v9 = vpop.eup %1527 }
 0x565   :  { %v394_v11 = vmul.f32 %v1528_v9, %v392_v8  ;;  %vm399_vm11 = vweird.f32 %v1528_v9 }
 0x566   :  { %vm400_vm13 = vmor %vm398_vm12, %vm399_vm11 }
 0x567   :  { %v395_v12 = vsub.f32 1.0, %v394_v11 }
 0x569   :  { %v396_v13 = vmul.f32 %v1528_v9, %v395_v12 }
 0x56b   :  { %v397_v1 = vadd.f32 %v1528_v9, %v396_v13 }
 0x56d   :  { %v401_v15 = vsel %vm400_vm13, %v1528_v9, %v397_v1 }
 0x56e   :  { %v406_v18 = vsel %vm403_vm14, %v405_v16, %v401_v15 }
 0x56f   :  { %v412_v21 = vmul.f32 %v410_v20, %v406_v18 }
 0x5b4   :  { %v415_v17 = vpop.permute.xlu2 %414 }
 0x5b5   :  { %v417_v19 = vmul.f32 %v415_v17, %v406_v18 }
 0x5b7   :  { %419 = vrot.lane.b32.xlu0 %v417_v19, %s1852_s26 }
 0x629   :  { %v420_v22 = vpop.permute.xlu0 %419 }
 0x62a   :  { %v422_v23 = vadd.f32 %v420_v22, %v412_v21 }
 0x62c   :  { %1529 = vtanh.f32 %v422_v23  ;;  %v485_v48 = vrot.slane %v422_v23, 7 }
 0x632   :  { %v1530_v24 = vpop.eup %1529 }
 0x633   :  { %425 = vrot.lane.b32.xlu1 %v1530_v24, %s1853_s27 }
 0x6a5   :  { %v426_v25 = vpop.permute.xlu1 %425 }
 0x6a6   :  { %v2019_v26 = vmul.f32 %v426_v25, %v406_v18 }
 0x6a8   :  { %v435_v27 = vrot.slane %v2019_v26, 2 }
 0x6aa   :  { %436 = vrot.lane.b32.xlu2 %v435_v27, %s1854_s7 }
 0x704   :  { %v437_v28 = vpop.permute.xlu2 %436 }
 0x705   :  { %1456 = vmatmul.msk.f32.vlgmr.msrb.gmra.mxu3 %vm220_vm6, %v437_v28 }
 0x788   :  { %v457_v29 = vpop.f32.mrf.mxu3 }
 0x789   :  { %v461_v30 = vrot.slane %v457_v29, 5 }
 0x78b   :  { %v463_v31 = vadd.f32 %v461_v30, %v1996_v10 }
 0x78d   :  { %1531 = vtanh.f32 %v463_v31  ;;  %v1457_v33 = vmul.f32 -1.442695, %v463_v31 }
 0x78f   :  { %1533 = vpow2.f32 %v1457_v33 }
 0x793   :  { %v1532_v32 = vpop.eup %1531 }
 0x794   :  { %489 = vrot.lane.b32.xlu0 %v1532_v32, %s1851_s0 }
 0x795   :  { %v1534_v34 = vpop.eup %1533 }
 0x796   :  { %v467_v35 = vadd.f32 1.0, %v1534_v34 }
 0x798   :  { %1535 = vrcp.f32 %v467_v35  ;;  %v479_v41 = vand.u32 2147483648, %v467_v35  ;;  %vm473_vm0 = vweird.f32 %v467_v35  ;;  %v477_v42 = vand.u32 2147483647, %v467_v35 }
 0x79a   :  { %v480_v44 = vor.u32 1.1754944e-38, %v479_v41  ;;  %vm478_vm2 = vcmp.eq.f32.partialorder %v477_v42, 8.507059e+37 }
 0x79e   :  { %v1536_v36 = vpop.eup %1535 }
 0x79f   :  { %v469_v37 = vmul.f32 %v1536_v36, %v467_v35  ;;  %vm474_vm15 = vweird.f32 %v1536_v36 }
 0x7a0   :  { %vm475_vm1 = vmor %vm473_vm0, %vm474_vm15 }
 0x7a1   :  { %v470_v38 = vsub.f32 1.0, %v469_v37 }
 0x7a3   :  { %v471_v39 = vmul.f32 %v1536_v36, %v470_v38 }
 0x7a5   :  { %v472_v40 = vadd.f32 %v1536_v36, %v471_v39 }
 0x7a7   :  { %v476_v43 = vsel %vm475_vm1, %v1536_v36, %v472_v40 }
 0x7a8   :  { %v481_v46 = vsel %vm478_vm2, %v480_v44, %v476_v43 }
 0x7a9   :  { %v487_v49 = vmul.f32 %v485_v48, %v481_v46 }
 0x806   :  { %v490_v45 = vpop.permute.xlu0 %489 }
 0x807   :  { %v492_v47 = vmul.f32 %v490_v45, %v481_v46 }
 0x809   :  { %494 = vrot.lane.b32.xlu1 %v492_v47, %s1852_s26 }
 0x87b   :  { %v495_v50 = vpop.permute.xlu1 %494 }
 0x87c   :  { %v497_v51 = vadd.f32 %v495_v50, %v487_v49 }
 0x87e   :  { %1537 = vtanh.f32 %v497_v51  ;;  %v560_v14 = vrot.slane %v497_v51, 7 }
 0x884   :  { %v1538_v52 = vpop.eup %1537 }
 0x885   :  { %500 = vrot.lane.b32.xlu2 %v1538_v52, %s1853_s27 }
 0x8df   :  { %v501_v53 = vpop.permute.xlu2 %500 }
 0x8e0   :  { %v2028_v54 = vmul.f32 %v501_v53, %v481_v46 }
 0x8e2   :  { %v510_v55 = vrot.slane %v2028_v54, 3 }
 0x8e4   :  { %511 = vrot.lane.b32.xlu0 %v510_v55, %s1854_s7 }
 0x956   :  { %v512_v56 = vpop.permute.xlu0 %511 }
 0x957   :  { %1458 = vmatmul.msk.f32.vlgmr.msra.gmra.mxu2 %vm220_vm6, %v512_v56 }
 0x9da   :  { %v532_v57 = vpop.f32.mrf.mxu2 }
 0x9db   :  { %v536_v58 = vrot.slane %v532_v57, 4 }
 0x9dd   :  { %v538_v59 = vadd.f32 %v536_v58, %v1996_v10 }
 0x9df   :  { %1539 = vtanh.f32 %v538_v59  ;;  %v1459_v62 = vmul.f32 -1.442695, %v538_v59 }
 0x9e1   :  { %1541 = vpow2.f32 %v1459_v62 }
 0x9e5   :  { %v1540_v60 = vpop.eup %1539 }
 0x9e6   :  { %564 = vrot.lane.b32.xlu1 %v1540_v60, %s1851_s0 }
 0x9e7   :  { %v1542_v63 = vpop.eup %1541 }
 0x9e8   :  { %v542_v0 = vadd.f32 1.0, %v1542_v63 }
 0x9ea   :  { %1543 = vrcp.f32 %v542_v0  ;;  %v554_v8 = vand.u32 2147483648, %v542_v0  ;;  %vm548_vm4 = vweird.f32 %v542_v0  ;;  %v552_v9 = vand.u32 2147483647, %v542_v0 }
 0x9ec   :  { %v555_v12 = vor.u32 1.1754944e-38, %v554_v8  ;;  %vm553_vm7 = vcmp.eq.f32.partialorder %v552_v9, 8.507059e+37 }
 0x9f0   :  { %v1544_v2 = vpop.eup %1543 }
 0x9f1   :  { %v544_v4 = vmul.f32 %v1544_v2, %v542_v0  ;;  %vm549_vm3 = vweird.f32 %v1544_v2 }
 0x9f2   :  { %vm550_vm5 = vmor %vm548_vm4, %vm549_vm3  ;;  %vm358_vm4 = vcmask 123905  }
 0x9f3   :  { %v545_v5 = vsub.f32 1.0, %v544_v4 }
 0x9f5   :  { %v546_v6 = vmul.f32 %v1544_v2, %v545_v5 }
 0x9f7   :  { %v547_v7 = vadd.f32 %v1544_v2, %v546_v6 }
 0x9f9   :  { %v551_v11 = vsel %vm550_vm5, %v1544_v2, %v547_v7  ;;  %vm583_vm5 = vcmask 126980  }
 0x9fa   :  { %v556_v1 = vsel %vm553_vm7, %v555_v12, %v551_v11  ;;  %vm433_vm7 = vcmask 124930  }
 0x9fb   :  { %v562_v15 = vmul.f32 %v560_v14, %v556_v1 }
 0xa58   :  { %v565_v13 = vpop.permute.xlu1 %564 }
 0xa59   :  { %v567_v3 = vmul.f32 %v565_v13, %v556_v1 }
 0xa5b   :  { %569 = vrot.lane.b32.xlu2 %v567_v3, %s1852_s26 }
 0xab5   :  { %v570_v16 = vpop.permute.xlu2 %569 }
 0xab6   :  { %v572_v17 = vadd.f32 %v570_v16, %v562_v15 }
 0xab8   :  { %1545 = vtanh.f32 %v572_v17  ;;  %v635_v43 = vrot.slane %v572_v17, 7 }
 0xabe   :  { %v1546_v18 = vpop.eup %1545 }
 0xabf   :  { %575 = vrot.lane.b32.xlu0 %v1546_v18, %s1853_s27 }
 0xb31   :  { %v576_v19 = vpop.permute.xlu0 %575 }
 0xb32   :  { %v2037_v20 = vmul.f32 %v576_v19, %v556_v1 }
 0xb34   :  { %v585_v21 = vrot.slane %v2037_v20, 4 }
 0xb36   :  { %586 = vrot.lane.b32.xlu1 %v585_v21, %s1854_s7 }
 0xba8   :  { %v587_v22 = vpop.permute.xlu1 %586 }
 0xba9   :  { %1460 = vmatmul.msk.f32.vlgmr.msra.gmra.mxu3 %vm220_vm6, %v587_v22 }
 0xc2c   :  { %v607_v23 = vpop.f32.mrf.mxu3 }
 0xc2d   :  { %v611_v24 = vrot.slane %v607_v23, 3 }
 0xc2f   :  { %v613_v25 = vadd.f32 %v611_v24, %v1996_v10 }
 0xc31   :  { %1547 = vtanh.f32 %v613_v25  ;;  %v1461_v28 = vmul.f32 -1.442695, %v613_v25 }
 0xc33   :  { %1549 = vpow2.f32 %v1461_v28 }
 0xc37   :  { %v1548_v27 = vpop.eup %1547 }
 0xc38   :  { %639 = vrot.lane.b32.xlu2 %v1548_v27, %s1851_s0 }
 0xc39   :  { %v1550_v29 = vpop.eup %1549 }
 0xc3a   :  { %v617_v30 = vadd.f32 1.0, %v1550_v29 }
 0xc3c   :  { %1551 = vrcp.f32 %v617_v30  ;;  %v629_v36 = vand.u32 2147483648, %v617_v30  ;;  %vm623_vm9 = vweird.f32 %v617_v30  ;;  %v627_v37 = vand.u32 2147483647, %v617_v30 }
 0xc3e   :  { %v630_v39 = vor.u32 1.1754944e-38, %v629_v36  ;;  %vm628_vm11 = vcmp.eq.f32.partialorder %v627_v37, 8.507059e+37 }
 0xc42   :  { %v1552_v31 = vpop.eup %1551 }
 0xc43   :  { %v619_v32 = vmul.f32 %v1552_v31, %v617_v30  ;;  %vm624_vm8 = vweird.f32 %v1552_v31 }
 0xc44   :  { %vm625_vm10 = vmor %vm623_vm9, %vm624_vm8  ;;  %vm658_vm8 = vcmask 128005   ;;  %vm508_vm9 = vcmask 125955  }
 0xc45   :  { %v620_v33 = vsub.f32 1.0, %v619_v32 }
 0xc47   :  { %v621_v34 = vmul.f32 %v1552_v31, %v620_v33 }
 0xc49   :  { %v622_v35 = vadd.f32 %v1552_v31, %v621_v34 }
 0xc4b   :  { %v626_v38 = vsel %vm625_vm10, %v1552_v31, %v622_v35  ;;  %vm733_vm10 = vcmask 129030  }
 0xc4c   :  { %v631_v41 = vsel %vm628_vm11, %v630_v39, %v626_v38  ;;  %vm808_vm11 = vcmask 130055  }
 0xc4d   :  { %v637_v44 = vmul.f32 %v635_v43, %v631_v41 }
 0xc92   :  { %v640_v40 = vpop.permute.xlu2 %639 }
 0xc93   :  { %v642_v42 = vmul.f32 %v640_v40, %v631_v41 }
 0xc95   :  { %644 = vrot.lane.b32.xlu0 %v642_v42, %s1852_s26 }
 0xd07   :  { %v645_v45 = vpop.permute.xlu0 %644 }
 0xd08   :  { %v647_v46 = vadd.f32 %v645_v45, %v637_v44 }
 0xd0a   :  { %1553 = vtanh.f32 %v647_v46  ;;  %v710_v12 = vrot.slane %v647_v46, 7 }
 0xd10   :  { %v1554_v47 = vpop.eup %1553 }
 0xd11   :  { %650 = vrot.lane.b32.xlu1 %v1554_v47, %s1853_s27 }
 0xd83   :  { %v651_v48 = vpop.permute.xlu1 %650 }
 0xd84   :  { %v2046_v49 = vmul.f32 %v651_v48, %v631_v41 }
 0xd86   :  { %v660_v50 = vrot.slane %v2046_v49, 5 }
 0xd88   :  { %661 = vrot.lane.b32.xlu2 %v660_v50, %s1854_s7  ;;  %v848_v50 = vld [vmem:[#allocation11 + $0x38] sm:$0xff] }
 0xd89   :  { %865 = vmatpush.msrb.mxu3 %v848_v50 }
 0xde2   :  { %v662_v51 = vpop.permute.xlu2 %661 }
 0xde3   :  { %1462 = vmatmul.msk.f32.vlgmr.msrb.gmra.mxu0 %vm220_vm6, %v662_v51  ;;  %v847_v51 = vld [vmem:[#allocation11 + $0x30] sm:$0xff] }
 0xde4   :  { %866 = vmatpush.msrb.mxu3 %v847_v51 }
 0xe60   :  { %v682_v52 = vpop.f32.mrf.mxu0 }
 0xe61   :  { %v686_v53 = vrot.slane %v682_v52, 2  ;;  %v846_v52 = vld [vmem:[#allocation11 + $0x28] sm:$0xff] }
 0xe62   :  { %867 = vmatpush.msrb.mxu3 %v846_v52  ;;  %v1087_v52 = vld [vmem:[#allocation15 + $0x40] sm:$0xff] }
 0xe63   :  { %v688_v55 = vadd.f32 %v686_v53, %v1996_v10  ;;  %v845_v53 = vld [vmem:[#allocation11 + $0x20] sm:$0xff] }
 0xe64   :  { %868 = vmatpush.msrb.mxu3 %v845_v53  ;;  %v1088_v53 = vld [vmem:[#allocation15 + $0x48] sm:$0xff] }
 0xe65   :  { %1555 = vtanh.f32 %v688_v55  ;;  %v1463_v57 = vmul.f32 -1.442695, %v688_v55  ;;  %v844_v55 = vld [vmem:[#allocation11 + $0x18] sm:$0xff] }
 0xe66   :  { %869 = vmatpush.msrb.mxu3 %v844_v55  ;;  %v1082_v55 = vld [vmem:[#allocation15 + $0x18] sm:$0xff] }
 0xe67   :  { %1557 = vpow2.f32 %v1463_v57 }
 0xe6b   :  { %v1556_v56 = vpop.eup %1555 }
 0xe6c   :  { %714 = vrot.lane.b32.xlu0 %v1556_v56, %s1851_s0 }
 0xe6d   :  { %v1558_v58 = vpop.eup %1557 }
 0xe6e   :  { %v692_v59 = vadd.f32 1.0, %v1558_v58  ;;  %v843_v58 = vld [vmem:[#allocation11 + $0x10] sm:$0xff] }
 0xe6f   :  { %870 = vmatpush.msrb.mxu3 %v843_v58 }
 0xe70   :  { %1559 = vrcp.f32 %v692_v59  ;;  %v704_v4 = vand.u32 2147483648, %v692_v59  ;;  %vm698_vm13 = vweird.f32 %v692_v59  ;;  %v702_v5 = vand.u32 2147483647, %v692_v59 }
 0xe72   :  { %v705_v7 = vor.u32 1.1754944e-38, %v704_v4  ;;  %vm703_vm15 = vcmp.eq.f32.partialorder %v702_v5, 8.507059e+37  ;;  %v1505_v4 = vld [vmem:[#allocation12] ss:$0 sm:$0xff] }
 0xe76   :  { %v1560_v60 = vpop.eup %1559 }
 0xe77   :  { %v694_v62 = vmul.f32 %v1560_v60, %v692_v59  ;;  %vm699_vm12 = vweird.f32 %v1560_v60  ;;  %v842_v59 = vld [vmem:[#allocation11 + $0x8] sm:$0xff] }
 0xe78   :  { %vm700_vm14 = vmor %vm698_vm13, %vm699_vm12  ;;  %871 = vmatpush.msrb.mxu3 %v842_v59  ;;  %vm853_vm12 = vcmask 523264   ;;  %vm877_vm13 = vcmask 15360  }
 0xe79   :  { %v695_v63 = vsub.f32 1.0, %v694_v62  ;;  %v1504_v62 = vld [vmem:[#allocation9] ss:$0 sm:$0xff] }
 0xe7b   :  { %v696_v0 = vmul.f32 %v1560_v60, %v695_v63 }
 0xe7d   :  { %v697_v2 = vadd.f32 %v1560_v60, %v696_v0 }
 0xe7f   :  { %v701_v6 = vsel %vm700_vm14, %v1560_v60, %v697_v2  ;;  %v841_v60 = vld [vmem:[#allocation11] sm:$0xff]  ;;  %vm929_vm14 = vcmask 64512  }
 0xe80   :  { %v706_v9 = vsel %vm703_vm15, %v705_v7, %v701_v6  ;;  %872 = vmatpush.msrb.mxu3 %v841_v60 }
 0xe81   :  { %v712_v13 = vmul.f32 %v710_v12, %v706_v9 }
 0xede   :  { %v715_v8 = vpop.permute.xlu0 %714 }
 0xedf   :  { %v717_v11 = vmul.f32 %v715_v8, %v706_v9 }
 0xee1   :  { %719 = vrot.lane.b32.xlu1 %v717_v11, %s1852_s26 }
 0xf53   :  { %v720_v1 = vpop.permute.xlu1 %719 }
 0xf54   :  { %v722_v3 = vadd.f32 %v720_v1, %v712_v13 }
 0xf56   :  { %1561 = vtanh.f32 %v722_v3  ;;  %v785_v39 = vrot.slane %v722_v3, 7 }
 0xf5c   :  { %v1562_v14 = vpop.eup %1561 }
 0xf5d   :  { %725 = vrot.lane.b32.xlu2 %v1562_v14, %s1853_s27 }
 0xfb7   :  { %v726_v15 = vpop.permute.xlu2 %725 }
 0xfb8   :  { %v728_v16 = vmul.f32 %v726_v15, %v706_v9 }
 0xfba   :  { %v735_v17 = vrot.slane %v728_v16, 6 }
 0xfbc   :  { %736 = vrot.lane.b32.xlu0 %v735_v17, %s1854_s7 }
0x102e   :  { %v737_v18 = vpop.permute.xlu0 %736 }
0x102f   :  { %1464 = vmatmul.msk.f32.vlgmr.msra.gmra.mxu0 %vm220_vm6, %v737_v18 }
0x10ac   :  { %v757_v19 = vpop.f32.mrf.mxu0 }
0x10ad   :  { %v761_v21 = vrot.slane %v757_v19, 1 }
0x10af   :  { %v763_v22 = vadd.f32 %v761_v21, %v1996_v10 }
0x10b1   :  { %1563 = vtanh.f32 %v763_v22  ;;  %v1465_v24 = vmul.f32 -1.442695, %v763_v22 }
0x10b3   :  { %1565 = vpow2.f32 %v1465_v24 }
0x10b7   :  { %v1564_v23 = vpop.eup %1563 }
0x10b8   :  { %789 = vrot.lane.b32.xlu1 %v1564_v23, %s1851_s0 }
0x10b9   :  { %v1566_v25 = vpop.eup %1565 }
0x10ba   :  { %v767_v27 = vadd.f32 1.0, %v1566_v25 }
0x10bc   :  { %1567 = vrcp.f32 %v767_v27  ;;  %v779_v32 = vand.u32 2147483648, %v767_v27  ;;  %vm773_vm1 = vweird.f32 %v767_v27  ;;  %v777_v33 = vand.u32 2147483647, %v767_v27 }
0x10be   :  { %vm778_vm3 = vcmp.eq.f32.partialorder %v777_v33, 8.507059e+37  ;;  %v963_v33 = vld [vmem:[#allocation14 + $0x48] sm:$0xff] }
0x10c0   :  { %355 = vrot.lane.b32.xlu1 %v2008_v61, %s1854_s7  ;;  %v780_v61 = vor.u32 1.1754944e-38, %v779_v32  ;;  %v962_v32 = vld [vmem:[#allocation14 + $0x40] sm:$0xff] }
0x10c2   :  { %v1568_v28 = vpop.eup %1567 }
0x10c3   :  { %v769_v29 = vmul.f32 %v1568_v28, %v767_v27  ;;  %vm774_vm0 = vweird.f32 %v1568_v28  ;;  %v959_v27 = vld [vmem:[#allocation14 + $0x28] sm:$0xff] }
0x10c4   :  { %vm775_vm2 = vmor %vm773_vm1, %vm774_vm0  ;;  %993 = vmatpush.msra.mxu1 %v959_v27 }
0x10c5   :  { %v770_v30 = vsub.f32 1.0, %v769_v29  ;;  %v954_v29 = vld [vmem:[#allocation14] sm:$0xff] }
0x10c6   :  { %994 = vmatpush.msra.mxu1 %v954_v29 }
0x10c7   :  { %v771_v31 = vmul.f32 %v1568_v28, %v770_v30  ;;  %v955_v30 = vld [vmem:[#allocation14 + $0x8] sm:$0xff] }
0x10c8   :  { %580 = vrot.lane.b32.xlu1 %v2037_v20, %s1854_s7  ;;  %1053 = vmatpush.msrb.mxu1 %v962_v32 }
0x10c9   :  { %v772_v10 = vadd.f32 %v1568_v28, %v771_v31  ;;  %v953_v31 = vld [vmem:[%s2118_s8] sm:$0xff] }
0x10ca   :  { %1469 = vmatmul.msk.f32.vlgmr.msra.gmra.mxu1 %vm220_vm6, %v953_v31 }
0x10cb   :  { %v776_v34 = vsel %vm775_vm2, %v1568_v28, %v772_v10  ;;  %v960_v28 = vld [vmem:[#allocation14 + $0x30] sm:$0xff]  ;;  %v961_v10 = vld [vmem:[#allocation14 + $0x38] sm:$0xff] }
0x10cc   :  { %v781_v20 = vsel %vm778_vm3, %v780_v61, %v776_v34  ;;  %v956_v34 = vld [vmem:[#allocation14 + $0x10] sm:$0xff]  ;;  %v957_v61 = vld [vmem:[#allocation14 + $0x18] sm:$0xff] }
0x10cd   :  { %v787_v40 = vmul.f32 %v785_v39, %v781_v20  ;;  %1054 = vmatpush.msrb.mxu1 %v957_v61  ;;  %v1096_v39 = vld [vmem:[#allocation15 + $0x88] sm:$0xff] }
0x10cf   :  { %1157 = vmatpush.msra.mxu1 %v1096_v39 }
0x10d2   :  { %1472 = vmatmul.msk.f32.vlgmr.msrb.gmra.mxu1 %vm220_vm6, %v953_v31 }
0x112a   :  { %v790_v35 = vpop.permute.xlu1 %789 }
0x112b   :  { %v792_v36 = vmul.f32 %v790_v35, %v781_v20  ;;  %v958_v35 = vld [vmem:[#allocation14 + $0x20] sm:$0xff] }
0x112d   :  { %794 = vrot.lane.b32.xlu2 %v792_v36, %s1852_s26  ;;  %v1089_v36 = vld [vmem:[#allocation15 + $0x50] sm:$0xff] }
0x1132   :  { %v356_v37 = vpop.permute.xlu1 %355 }
0x1133   :  { %359 = vst.msk [vmem:[#allocation2] sm:$0x2] %vm358_vm4, %v356_v37 }
0x1135   :  { %430 = vrot.lane.b32.xlu2 %v2019_v26, %s1854_s7 }
0x113a   :  { %v581_v38 = vpop.permute.xlu1 %580 }
0x113b   :  { %584 = vst.msk [vmem:[#allocation2] sm:$0x10] %vm583_vm5, %v581_v38  ;;  %v1095_v38 = vld [vmem:[#allocation15 + $0x80] sm:$0xff] }
0x113d   :  { %655 = vrot.lane.b32.xlu2 %v2046_v49, %s1854_s7  ;;  %v812_v49 = vld [vmem:[%s2114_s4 + $0x8] sm:$0xff] }
0x113e   :  { %834 = vmatpush.msrb.mxu2 %v812_v49  ;;  %v1080_v49 = vld [vmem:[#allocation15 + $0x8] sm:$0xff] }
0x1187   :  { %v795_v41 = vpop.permute.xlu2 %794 }
0x1188   :  { %v797_v42 = vadd.f32 %v795_v41, %v787_v40  ;;  %v1097_v40 = vld [vmem:[#allocation15 + $0x90] sm:$0xff]  ;;  %v1090_v41 = vld [vmem:[#allocation15 + $0x58] sm:$0xff] }
0x118a   :  { %1569 = vtanh.f32 %v797_v42  ;;  %v1091_v42 = vld [vmem:[#allocation15 + $0x60] sm:$0xff] }
0x118b   :  { %1158 = vmatpush.msra.mxu1 %v1091_v42 }
0x118f   :  { %v431_v43 = vpop.permute.xlu2 %430 }
0x1190   :  { %v1570_v44 = vpop.eup %1569  ;;  %434 = vst.msk [vmem:[#allocation2] sm:$0x4] %vm433_vm7, %v431_v43  ;;  %v1092_v43 = vld [vmem:[#allocation15 + $0x68] sm:$0xff] }
0x1191   :  { %800 = vrot.lane.b32.xlu0 %v1570_v44, %s1853_s27  ;;  %v1098_v44 = vld [vmem:[#allocation15 + $0x98] sm:$0xff] }
0x1197   :  { %v656_v45 = vpop.permute.xlu2 %655 }
0x1198   :  { %659 = vst.msk [vmem:[#allocation2] sm:$0x20] %vm658_vm8, %v656_v45  ;;  %v1093_v45 = vld [vmem:[#allocation15 + $0x70] sm:$0xff] }
0x1199   :  { %505 = vrot.lane.b32.xlu0 %v2028_v54, %s1854_s7  ;;  %v811_v54 = vld [vmem:[%s2114_s4] sm:$0xff] }
0x119a   :  { %835 = vmatpush.msrb.mxu2 %v811_v54  ;;  %v1081_v54 = vld [vmem:[#allocation15 + $0x10] sm:$0xff] }
0x119c   :  { %1013 = vmatpush.msra.mxu2 %v960_v28 }
0x119e   :  { %1014 = vmatpush.msra.mxu2 %v955_v30 }
0x11a1   :  { %730 = vrot.lane.b32.xlu0 %v728_v16, %s1854_s7 }
0x1203   :  { %v801_v26 = vpop.permute.xlu0 %800 }
0x1204   :  { %v803_v46 = vmul.f32 %v801_v26, %v781_v20  ;;  %v1094_v20 = vld [vmem:[#allocation15 + $0x78] sm:$0xff]  ;;  %v1084_v26 = vld [vmem:[#allocation15 + $0x28] sm:$0xff] }
0x1205   :  { %1117 = vmatpush.msra.mxu3 %v1094_v20 }
0x1206   :  { %805 = vrot.lane.b32.xlu1 %v803_v46, %s1854_s7  ;;  %v1085_v46 = vld [vmem:[#allocation15 + $0x30] sm:$0xff] }
0x1207   :  { %1118 = vmatpush.msra.mxu3 %v1089_v36  ;;  %1239 = vmatpush.msrb.mxu1 %v1085_v46 }
0x1209   :  { %1240 = vmatpush.msrb.mxu1 %v1080_v49  ;;  %v1393_v49 = vld [vmem:[#allocation17 + $0x70] sm:$0xff] }
0x120b   :  { %v506_v47 = vpop.permute.xlu0 %505 }
0x120c   :  { %509 = vst.msk [vmem:[#allocation2] sm:$0x8] %vm508_vm9, %v506_v47  ;;  %v1086_v47 = vld [vmem:[#allocation15 + $0x38] sm:$0xff] }
0x1213   :  { %v731_v48 = vpop.permute.xlu0 %730 }
0x1214   :  { %734 = vst.msk [vmem:[#allocation2] sm:$0x40] %vm733_vm10, %v731_v48  ;;  %v1079_v48 = vld [vmem:[#allocation15] sm:$0xff] }
0x1278   :  { %v806_v56 = vpop.permute.xlu1 %805 }
0x1279   :  { %809 = vst.msk [vmem:[#allocation2] sm:$0x80] %vm808_vm11, %v806_v56  ;;  %v1083_v56 = vld [vmem:[#allocation15 + $0x20] sm:$0xff] }
0x1280   :  { %v810_v57 = vld [vmem:[#allocation2] sm:$0xff] }
0x1281   :  { %1466 = vmatmul.msk.f32.vlgmr.msrb.gmra.mxu2 %vm220_vm6, %v810_v57  ;;  %948 = vmatpush.msrb.mxu0 %v810_v57  ;;  %v996_v57 = vpop.f32.mrf.mxu1 }
0x1282   :  { %1073 = vmatpush.msrb.mxu2 %v963_v33 }
0x1283   :  { %1033 = vmatpush.msra.mxu0 %v961_v10 }
0x1284   :  { %1074 = vmatpush.msrb.mxu2 %v958_v35 }
0x1285   :  { %1034 = vmatpush.msra.mxu0 %v956_v34 }
0x1289   :  { %1470 = vmatmul.msk.f32.vlgmr.msra.gmra.mxu2 %vm220_vm6, %v953_v31  ;;  %v1056_v60 = vpop.f32.mrf.mxu1 }
0x128a   :  { %1177 = vmatpush.msra.mxu2 %v1097_v40 }
0x128c   :  { %1178 = vmatpush.msra.mxu2 %v1092_v43 }
0x1291   :  { %1473 = vmatmul.msk.f32.vlgmr.msrb.gmra.mxu2 %vm220_vm6, %v953_v31 }
0x1292   :  { %1259 = vmatpush.msrb.mxu2 %v1086_v47 }
0x1294   :  { %1260 = vmatpush.msrb.mxu2 %v1081_v54 }
0x1304   :  { %v837_v63 = vpop.f32.mrf.mxu2 }
0x1305   :  { %v838_v0 = vadd.f32 %v1504_v62, %v837_v63 }
0x1307   :  { %v840_v2 = vmax.f32 %v838_v0, 0.0 }
0x1309   :  { %1467 = vmatmul.msk.f32.vlgmr.msrb.gmra.mxu3 %vm853_vm12, %v840_v2 }
0x130a   :  { %1197 = vmatpush.msrb.mxu3 %v1098_v44 }
0x130c   :  { %1198 = vmatpush.msrb.mxu3 %v1093_v45  ;;  %v1016_v58 = vpop.f32.mrf.mxu2 }
0x1314   :  { %v1076_v62 = vpop.f32.mrf.mxu2 }
0x138c   :  { %v874_v5 = vpop.f32.mrf.mxu3 }
0x138d   :  { %v875_v6 = vadd.f32 %v1505_v4, %v874_v5 }
0x138f   :  { %v878_v7 = vsel %vm877_vm13, %v875_v6, -inf }
0x1390   :  { %v879_v8 = vrot.slane %v878_v7, 4 }
0x1392   :  { %v880_v9 = vmax.f32 %v878_v7, %v879_v8 }
0x1394   :  { %v881_v11 = vrot.slane %v880_v9, 2 }
0x1396   :  { %v882_v12 = vmax.f32 %v880_v9, %v881_v11 }
0x1398   :  { %v883_v13 = vrot.slane %v882_v12, 1 }
0x139a   :  { %v884_v1 = vmax.f32 %v882_v12, %v883_v13  ;;  %v964_v13 = vld [vmem:[%s2120_s10] sm:$0x1f] }
0x139b   :  { %v969_v33 = vperm.slane %v964_v13, 3 }
0x139c   :  { %v885_v3 = vsub.f32 %v875_v6, %v884_v1  ;;  %v1305_v6 = vld [vmem:[%s2122_s12] sm:$0x1f] }
0x139d   :  { %v1307_v9 = vperm.slane %v1305_v6, 0  ;;  %v1308_v12 = vperm.slane %v1305_v6, 1  ;;  %v1311_v28 = vperm.slane %v1305_v6, 4  ;;  %v1310_v10 = vperm.slane %v1305_v6, 3 }
0x139e   :  { %v886_v14 = vmul.f32 1.442695, %v885_v3  ;;  %v1309_v3 = vperm.slane %v1305_v6, 2  ;;  %v1057_v40 = vadd.f32 %v1056_v60, %v969_v33 }
0x13a0   :  { %1571 = vpow2.f32 %v886_v14 }
0x13a6   :  { %v1572_v15 = vpop.eup %1571 }
0x13a7   :  { %v888_v16 = vsel %vm877_vm13, %v1572_v15, 0.0 }
0x13a8   :  { %v889_v17 = vrot.slane %v888_v16, 4 }
0x13aa   :  { %v890_v18 = vadd.f32 %v889_v17, %v888_v16 }
0x13ac   :  { %v891_v19 = vrot.slane %v890_v18, 2 }
0x13ae   :  { %v892_v21 = vadd.f32 %v891_v19, %v890_v18  ;;  %v966_v19 = vperm.slane %v964_v13, 0 }
0x13b0   :  { %v893_v22 = vrot.slane %v892_v21, 1  ;;  %v997_v29 = vadd.f32 %v996_v57, %v966_v19  ;;  %v1387_v19 = vld [vmem:[#allocation17 + $0x40] sm:$0xff] }
0x13b2   :  { %v894_v23 = vadd.f32 %v893_v22, %v892_v21  ;;  %v967_v21 = vperm.slane %v964_v13, 1  ;;  %v968_v22 = vperm.slane %v964_v13, 2 }
0x13b4   :  { %1573 = vrcp.f32 %v894_v23  ;;  %v1017_v30 = vadd.f32 %v1016_v58, %v967_v21  ;;  %v1386_v21 = vld [vmem:[#allocation17 + $0x38] sm:$0xff] }
0x13ba   :  { %v1574_v24 = vpop.eup %1573 }
0x13bb   :  { %v896_v25 = vmul.f32 %v1574_v24, %v1572_v15 }
0x13bd   :  { %897 = vxpose.xlu2.b32.start.end [1/1] (short) (narrow) %v896_v25, 8 }
0x1456   :  { %v913_v37 = vpop.trf.xlu2 }
0x1457   :  { %1468 = vmatmul.msk.f32.vlgmr.msrb.gmra.mxu0 %vm929_vm14, %v913_v37  ;;  %v970_v37 = vperm.slane %v964_v13, 4 }
0x1458   :  { %1137 = vmatpush.msrb.mxu0 %v1095_v38 }
0x1459   :  { %v1077_v44 = vadd.f32 %v1076_v62, %v970_v37  ;;  %v1506_v37 = vld [vmem:[%s2124_s14] ss:$0 sm:$0xff] }
0x145a   :  { %1138 = vmatpush.msrb.mxu0 %v1090_v41 }
0x145f   :  { %1471 = vmatmul.msk.f32.vlgmr.msra.gmra.mxu0 %vm220_vm6, %v953_v31 }
0x1460   :  { %1219 = vmatpush.msra.mxu0 %v1084_v26 }
0x1462   :  { %1220 = vmatpush.msra.mxu0 %v1079_v48  ;;  %v1394_v48 = vld [vmem:[#allocation17 + $0x78] sm:$0xff] }
0x14d4   :  { %v950_v50 = vpop.f32.mrf.mxu0 }
0x14d5   :  { %v1100_v51 = vrot.slane %v950_v50, 1 }
0x14d7   :  { %1474 = vmatmul.msk.f32.vlgmr.msra.gmra.mxu3 %vm220_vm6, %v1100_v51  ;;  %1475 = vmatmul.msk.f32.vlgmr.msrb.gmra.mxu0 %vm220_vm6, %v1100_v51 }
0x14d8   :  { %1476 = vmatmul.msk.f32.vlgmr.msra.gmra.mxu1 %vm220_vm6, %v1100_v51  ;;  %1477 = vmatmul.msk.f32.vlgmr.msra.gmra.mxu2 %vm220_vm6, %v1100_v51 }
0x14d9   :  { %1279 = vmatpush.msra.mxu3 %v1087_v52  ;;  %1299 = vmatpush.msrb.mxu0 %v1088_v53  ;;  %v1391_v53 = vld [vmem:[#allocation17 + $0x60] sm:$0xff] }
0x14da   :  { %1399 = vmatpush.msra.mxu1 %v1394_v48 }
0x14db   :  { %1280 = vmatpush.msra.mxu3 %v1082_v55  ;;  %1300 = vmatpush.msrb.mxu0 %v1083_v56  ;;  %v1390_v56 = vld [vmem:[#allocation17 + $0x58] sm:$0xff] }
0x14dc   :  { %v1036_v59 = vpop.f32.mrf.mxu0  ;;  %1400 = vmatpush.msra.mxu1 %v1393_v49 }
0x14dd   :  { %v1037_v32 = vadd.f32 %v1036_v59, %v968_v22  ;;  %v1385_v22 = vld [vmem:[#allocation17 + $0x30] sm:$0xff] }
0x14df   :  { %1478 = vmatmul.msk.f32.vlgmr.msrb.gmra.mxu3 %vm220_vm6, %v1100_v51  ;;  %1479 = vmatmul.msk.f32.vlgmr.msra.gmra.mxu0 %vm220_vm6, %v950_v50 }
0x14e0   :  { %1480 = vmatmul.msk.f32.vlgmr.msrb.gmra.mxu1 %vm220_vm6, %v950_v50  ;;  %1481 = vmatmul.msk.f32.vlgmr.msrb.gmra.mxu2 %vm220_vm6, %v950_v50 }
0x14e7   :  { %1482 = vmatmul.msk.f32.vlgmr.msra.gmra.mxu3 %vm220_vm6, %v950_v50  ;;  %1483 = vmatmul.msk.f32.vlgmr.msrb.gmra.mxu0 %vm220_vm6, %v950_v50  ;;  %v1392_v50 = vld [vmem:[#allocation17 + $0x68] sm:$0xff] }
0x14e8   :  { %1401 = vmatpush.msra.mxu1 %v1392_v50 }
0x14ea   :  { %1402 = vmatpush.msra.mxu1 %v1391_v53 }
0x14ec   :  { %1403 = vmatpush.msra.mxu1 %v1390_v56 }
0x1554   :  { %v1140_v63 = vpop.f32.mrf.mxu0 }
0x1555   :  { %v1160_v0 = vpop.f32.mrf.mxu1 }
0x155a   :  { %v1120_v2 = vpop.f32.mrf.mxu3 }
0x155b   :  { %v1180_v4 = vpop.f32.mrf.mxu2 }
0x155c   :  { %v1222_v5 = vpop.f32.mrf.mxu0 }
0x155d   :  { %v1242_v7 = vpop.f32.mrf.mxu1  ;;  %v1223_v8 = vadd.f32 %v1222_v5, %v1120_v2 }
0x155e   :  { %v1243_v11 = vadd.f32 %v1242_v7, %v1140_v63 }
0x155f   :  { %v1317_v14 = vadd.f32 %v1307_v9, %v1223_v8 }
0x1560   :  { %v1318_v15 = vadd.f32 %v1308_v12, %v1243_v11 }
0x1561   :  { %v1322_v24 = vperm.slane %v1317_v14, 0 }
0x1562   :  { %v1200_v1 = vpop.f32.mrf.mxu3  ;;  %v1323_v25 = vperm.slane %v1318_v15, 0 }
0x1563   :  { %v1262_v16 = vpop.f32.mrf.mxu2  ;;  %v1327_v61 = vmul.f32 %v1322_v24, %v997_v29  ;;  %v1383_v24 = vld [vmem:[#allocation17 + $0x20] sm:$0xff] }
0x1564   :  { %v1263_v17 = vadd.f32 %v1262_v16, %v1160_v0  ;;  %v1302_v18 = vpop.f32.mrf.mxu0  ;;  %v1328_v35 = vmul.f32 %v1323_v25, %v1017_v30  ;;  %v1382_v25 = vld [vmem:[#allocation17 + $0x18] sm:$0xff]  ;;  %v1379_v29 = vld [vmem:[#allocation17] sm:$0xff] }
0x1565   :  { %v1303_v27 = vadd.f32 %v1302_v18, %v1200_v1  ;;  %v1388_v18 = vld [vmem:[#allocation17 + $0x48] sm:$0xff] }
0x1566   :  { %v1319_v23 = vadd.f32 %v1309_v3, %v1263_v17  ;;  %v1332_v41 = vadd.f32 %v1328_v35, %v1327_v61  ;;  %v1389_v17 = vld [vmem:[#allocation17 + $0x50] sm:$0xff] }
0x1567   :  { %v1321_v20 = vadd.f32 %v1311_v28, %v1303_v27  ;;  %1404 = vmatpush.msra.mxu1 %v1389_v17  ;;  %v1381_v27 = vld [vmem:[#allocation17 + $0x10] sm:$0xff]  ;;  %v1380_v28 = vld [vmem:[#allocation17 + $0x8] sm:$0xff] }
0x1568   :  { %v1324_v31 = vperm.slane %v1319_v23, 0  ;;  %v1384_v23 = vld [vmem:[#allocation17 + $0x28] sm:$0xff] }
0x1569   :  { %v1326_v42 = vperm.slane %v1321_v20, 0  ;;  %1405 = vmatpush.msra.mxu1 %v1388_v18 }
0x156a   :  { %v1282_v34 = vpop.f32.mrf.mxu3  ;;  %v1329_v38 = vmul.f32 %v1324_v31, %v1037_v32 }
0x156b   :  { %v1283_v36 = vadd.f32 %v1282_v34, %v1180_v4  ;;  %v1331_v46 = vmul.f32 %v1326_v42, %v1077_v44  ;;  %1406 = vmatpush.msra.mxu1 %v1387_v19 }
0x156c   :  { %v1333_v45 = vadd.f32 %v1332_v41, %v1329_v38 }
0x156d   :  { %v1320_v39 = vadd.f32 %v1310_v10, %v1283_v36  ;;  %1407 = vmatpush.msra.mxu1 %v1386_v21 }
0x156f   :  { %v1325_v43 = vperm.slane %v1320_v39, 0  ;;  %1408 = vmatpush.msra.mxu1 %v1385_v22 }
0x1571   :  { %v1330_v26 = vmul.f32 %v1325_v43, %v1057_v40  ;;  %1409 = vmatpush.msra.mxu1 %v1384_v23 }
0x1573   :  { %v1334_v47 = vadd.f32 %v1333_v45, %v1330_v26  ;;  %1410 = vmatpush.msra.mxu1 %v1383_v24 }
0x1575   :  { %v1335_v54 = vadd.f32 %v1334_v47, %v1331_v46  ;;  %1411 = vmatpush.msra.mxu1 %v1382_v25 }
0x1577   :  { %v1336_v51 = vmax.f32 %v1335_v54, 0.0  ;;  %v1349_v52 = vsub.f32 0.0, %v1335_v54  ;;  %1412 = vmatpush.msra.mxu1 %v1381_v27 }
0x1579   :  { %v1350_v55 = vmax.f32 %v1349_v52, 0.0  ;;  %1575 = vrsqrt.f32 %v1336_v51  ;;  %vm1344_vm6 = vcmp.eq.f32.partialorder %v1336_v51, inf  ;;  %v1347_v12 = vand.u32 2147483648, %v1336_v51  ;;  %1413 = vmatpush.msra.mxu1 %v1380_v28 }
0x157a   :  { %vm1346_vm0 = vcmp.eq.f32.partialorder %v1336_v51, 0.0 }
0x157b   :  { %1577 = vrsqrt.f32 %v1350_v55  ;;  %vm1358_vm15 = vcmp.eq.f32.partialorder %v1350_v55, inf  ;;  %v1361_v13 = vand.u32 2147483648, %v1350_v55  ;;  %vm1360_vm1 = vcmp.eq.f32.partialorder %v1350_v55, 0.0  ;;  %1414 = vmatpush.msra.mxu1 %v1379_v29 }
0x157f   :  { %v1576_v57 = vpop.eup %1575 }
0x1580   :  { %v1338_v58 = vmul.f32 %v1576_v57, %v1336_v51 }
0x1581   :  { %v1578_v59 = vpop.eup %1577 }
0x1582   :  { %v1339_v60 = vmul.f32 %v1576_v57, %v1338_v58  ;;  %v1352_v62 = vmul.f32 %v1578_v59, %v1350_v55 }
0x1584   :  { %v1340_v63 = vmul.f32 0.5, %v1339_v60  ;;  %v1353_v0 = vmul.f32 %v1578_v59, %v1352_v62 }
0x1586   :  { %v1341_v2 = vsub.f32 1.5, %v1340_v63  ;;  %v1354_v4 = vmul.f32 0.5, %v1353_v0 }
0x1588   :  { %v1342_v5 = vmul.f32 %v1576_v57, %v1341_v2  ;;  %v1355_v6 = vsub.f32 1.5, %v1354_v4 }
0x158a   :  { %v1343_v7 = vmul.f32 %v1342_v5, %v1336_v51  ;;  %v1356_v8 = vmul.f32 %v1578_v59, %v1355_v6 }
0x158c   :  { %v1345_v9 = vsel %vm1344_vm6, %v1336_v51, %v1343_v7  ;;  %v1357_v11 = vmul.f32 %v1356_v8, %v1350_v55 }
0x158d   :  { %v1348_v3 = vsel %vm1346_vm0, %v1347_v12, %v1345_v9 }
0x158e   :  { %v1359_v1 = vsel %vm1358_vm15, %v1350_v55, %v1357_v11 }
0x158f   :  { %v1362_v14 = vsel %vm1360_vm1, %v1361_v13, %v1359_v1 }
0x1590   :  { %v1363_v15 = vsub.f32 %v1348_v3, %v1362_v14 }
0x1592   :  { %v1364_v16 = vmul.f32 %v1363_v15, %v1363_v15 }
0x1594   :  { %1365 = vadd.xlane.f32.xlu0 %v1364_v16 }
0x1607   :  { %v1366_v30 = vpop.xlane.xlu0 %1365 }
0x1608   :  { %v1367_v31 = vmax.f32 %v1366_v30, 1e-24 }
0x160a   :  { %1579 = vrsqrt.f32 %v1367_v31  ;;  %vm1374_vm3 = vweird.f32 %v1367_v31 }
0x1610   :  { %v1580_v10 = vpop.eup %1579 }
0x1611   :  { %v1369_v32 = vmul.f32 %v1580_v10, %v1367_v31  ;;  %vm1375_vm2 = vweird.f32 %v1580_v10 }
0x1612   :  { %vm1376_vm4 = vmor %vm1374_vm3, %vm1375_vm2 }
0x1613   :  { %v1370_v33 = vmul.f32 %v1580_v10, %v1369_v32 }
0x1615   :  { %v1371_v34 = vmul.f32 0.5, %v1370_v33 }
0x1617   :  { %v1372_v61 = vsub.f32 1.5, %v1371_v34 }
0x1619   :  { %v1373_v35 = vmul.f32 %v1580_v10, %v1372_v61 }
0x161b   :  { %v1377_v20 = vsel %vm1376_vm4, %v1580_v10, %v1373_v35 }
0x161c   :  { %v1378_v36 = vmul.f32 %v1377_v20, %v1363_v15 }
0x161e   :  { %1415 = vmatmul.f32.vlgmr.msra.gmra.mxu1 %v1378_v36 }
0x169b   :  { %v1416_v38 = vpop.f32.mrf.mxu1 }
0x169c   :  { %v1417_v39 = vadd.f32 %v1506_v37, %v1416_v38 }
0x169e   :  { %1419 = vmax.xlane.f32.xlu1 %v1417_v39 }
0x1711   :  { %v1420_v40 = vpop.xlane.xlu1 %1419 }
0x1712   :  { %v1421_v41 = vsub.f32 %v1417_v39, %v1420_v40 }
0x1714   :  { %v1422_v42 = vmul.f32 1.442695, %v1421_v41 }
0x1716   :  { %1581 = vpow2.f32 %v1422_v42 }
0x171c   :  { %v1582_v43 = vpop.eup %1581 }
0x171d   :  { %1424 = vadd.xlane.f32.xlu2 %v1582_v43 }
0x1790   :  { %v1425_v44 = vpop.xlane.xlu2 %1424 }
0x1791   :  { %1583 = vrcp.f32 %v1425_v44 }
0x1797   :  { %v1584_v45 = vpop.eup %1583 }
0x1798   :  { %v1427_v26 = vmul.f32 %v1584_v45, %v1582_v43 }
0x179a   :  { %1428 = vst [vmem:[#allocation18] sm:$0xff] %v1427_v26 }
0x179b   :  { %1439 = dma.vmem_to_hbm [thread:$0]  %s1435_s3, 128, %s1437_s24, [#allocation5]  }
0x179c   :  { %1835 = dma.done.wait [#allocation5], 128  }
0x179d   :  { %1836 = vsyncadd [#allocation5], 4294967168 }
0x179e   :  { %1444 = vsyncpa [#allocation4], 1 }
0x179f   :  { %1445 = vsyncpa [#allocation7], 1 }
0x17a0   :  { %1446 = vsyncpa [#allocation10], 1 }
0x17a1   :  { %1447 = vsyncpa [#allocation13], 1 }
0x17a2   :  { %1448 = vsyncpa [#allocation16], 1 }
0x17a3   :  { %1449 = vsyncpa [#allocation5], 1 }

</bundles_post_ra>
